<compile_context>
chip_gen: v7x
topology: tpu7x:2x2x1
jax: 0.10.0
libtpu: 0.0.40
codegen_flags: <defaults>
</compile_context>

<pallas_src>
import functools

import jax
import jax.numpy as jnp
from jax import lax
from jax.experimental import pallas as pl
from jax.experimental.pallas import tpu as pltpu

# ---------------- model dims (small, consistent with JambaMambaMixer) ----------------
BATCH = 2
SEQ = 8
HIDDEN = 32          # hidden_size
DINNER = 64          # intermediate_size
DSTATE = 8           # ssm_state_size
DCONV = 4            # conv_kernel_size
DTRANK = 8           # time_step_rank

M = BATCH * SEQ      # flattened tokens
BD = BATCH * DINNER  # batch folded into lanes (= 128)

# packed per-channel parameter rows (all pre-duplicated to BD lanes host-side)
_ROW_A = 0                   # rows 0..7  : A (negative), (DSTATE, BD)
_ROW_CW = _ROW_A + DSTATE    # rows 8..11 : conv taps (DCONV, BD)
_ROW_CB = _ROW_CW + DCONV    # row 12     : conv bias
_ROW_D = _ROW_CB + 1         # row 13     : D
_ROW_DTB = _ROW_D + 1        # row 14     : dt_proj bias
_ROW_LN = _ROW_DTB + 1       # row 15     : [dt_ln(8) | B_ln(8) | C_ln(8) | pad]
_CP_ROWS = _ROW_LN + 1       # 16

# ---------------- synthetic "act_scales" and per-tensor weight scales ----------------
S_INPROJ_IN = 0.04     # in_proj:input
S_INPROJ_OUT = 0.1     # in_proj:output  (== conv1d input scale == z_scale)
S_XPROJ_IN = 0.03      # x_proj:input    (== conv1d output scale == u_scale)
S_DT_LN_OUT = 0.02     # dt_layernorm:output (== dt_proj:input)
S_B_LN_OUT = 0.02      # B_layernorm:output
S_C_LN_OUT = 0.02      # C_layernorm:output
S_DTPROJ_OUT = 0.03    # dt_proj:output
S_OUTPROJ_IN = 0.2     # out_proj:input
W_SCALE = 0.01         # per-tensor int8 weight scale for all quantized linears
RMS_EPS = 1e-6


def _qround(x):
    """round + clamp to int8 code range (kept as f32 'codes').

    Range is [-128, 127], matching the reference QJambaRMSNorm
    (`.round().clamp(min=-128, max=127)`)."""
    return jnp.clip(jnp.round(x), -128.0, 127.0)


# ---------------- single fused Pallas kernel -----------------------------------------

def _make_kernel(use_int8_mxu):
    """Builds the fused kernel; the quantized-GEMM path is chosen per TPU generation."""

    if use_int8_mxu:
        # native int8 MXU (v5e/v6e): int8 x int8 -> int32 accum, scales applied after.
        def qmm(codes_f32, w_ref):
            a = codes_f32.astype(jnp.int32).astype(jnp.int8)
            acc = jnp.dot(a, w_ref[...], preferred_element_type=jnp.int32)
            return acc.astype(jnp.float32)
    else:
        # bf16 codes path (exact: int8 codes are exact in bf16, f32 accumulation).
        def qmm(codes_f32, w_ref):
            w = w_ref[...].astype(jnp.float32).astype(jnp.bfloat16)
            return jnp.dot(codes_f32.astype(jnp.bfloat16), w,
                           preferred_element_type=jnp.float32)

    def kernel(hs_ref, w_in_ref, w_x_ref, w_dt_ref, w_out_ref, cp_ref, o_ref):
        # ---- unpack the packed per-channel params (already BD-wide) -----------------
        A2 = cp_ref[_ROW_A:_ROW_A + DSTATE, :]            # (N, BD)
        w_conv2 = cp_ref[_ROW_CW:_ROW_CW + DCONV, :]      # (DCONV, BD)
        b_conv2 = cp_ref[_ROW_CB:_ROW_CB + 1, :]          # (1, BD)
        dpar2 = cp_ref[_ROW_D:_ROW_D + 1, :]              # (1, BD)
        dtb2 = cp_ref[_ROW_DTB:_ROW_DTB + 1, :]           # (1, BD)
        ln_row = cp_ref[_ROW_LN:_ROW_LN + 1, :]           # (1, BD)
        w_dtln = ln_row[:, 0:DTRANK]
        w_bln = ln_row[:, DTRANK:DTRANK + DSTATE]
        w_cln = ln_row[:, DTRANK + DSTATE:DTRANK + 2 * DSTATE]

        # ---- in_proj (W8A8B8O8): quantize -> GEMM -> requant int8 codes -------------
        xq = _qround(hs_ref[...] / S_INPROJ_IN)                            # (M, H)
        proj = qmm(xq, w_in_ref) * (S_INPROJ_IN * W_SCALE / S_INPROJ_OUT)  # (M, 2D)
        proj_q = _qround(proj)

        # fold batch into lanes: (M, C) -> (SEQ, 2C); unfold is the inverse
        def fold(x):
            return jnp.concatenate([x[0:SEQ, :], x[SEQ:M, :]], axis=1)

        def unfold(x):
            half = x.shape[1] // 2
            return jnp.concatenate([x[:, :half], x[:, half:]], axis=0)

        x_fold = fold(proj_q[:, :DINNER])                                  # (SEQ, BD) codes
        z_fold = fold(proj_q[:, DINNER:])                                  # gate codes

        # ---- QCausalConv1D: depthwise causal conv on codes via XLU sublane rolls ----
        row = lax.broadcasted_iota(jnp.int32, (SEQ, BD), 0)
        conv_acc = jnp.zeros((SEQ, BD), jnp.float32)
        for k in range(DCONV):                                             # static taps
            s = DCONV - 1 - k
            if s == 0:
                shifted = x_fold
            else:
                # shifted[l] = codes[l - s] for l >= s, else 0   (exact, no MXU)
                shifted = jnp.where(row >= s,
                                    pltpu.roll(x_fold, shift=s, axis=0), 0.0)
            conv_acc = conv_acc + w_conv2[k:k + 1, :] * shifted
        conv_out = conv_acc * S_INPROJ_OUT + b_conv2                       # dequant + bias
        act = conv_out * lax.logistic(conv_out)                            # SiLU
        u_codes = _qround(act / S_XPROJ_IN)                                # (SEQ, BD)

        # ---- x_proj (W8A8BF16OF16) ---------------------------------------------------
        u_flat = unfold(u_codes)                                           # (M, D)
        ssm = qmm(u_flat, w_x_ref) * (S_XPROJ_IN * W_SCALE)                # (M, R+2N)

        # ---- dt / B / C QJambaRMSNorm (+ quantize to int8 codes) ---------------------
        def rms_q(x, w, scale):
            var = jnp.mean(x * x, axis=-1, keepdims=True)
            xn = x * lax.rsqrt(var + RMS_EPS)
            return _qround((w * xn) / scale)

        dt_codes = rms_q(ssm[:, 0:DTRANK], w_dtln, S_DT_LN_OUT)                  # (M, R)
        b_codes = rms_q(ssm[:, DTRANK:DTRANK + DSTATE], w_bln, S_B_LN_OUT)       # (M, N)
        c_codes = rms_q(ssm[:, DTRANK + DSTATE:DTRANK + 2 * DSTATE],
                        w_cln, S_C_LN_OUT)                                       # (M, N)

        # ---- dt_proj (W8A8B8O8, bias folded into the scan as dt_bias) ---------------
        dtp = qmm(dt_codes, w_dt_ref) * (S_DT_LN_OUT * W_SCALE / S_DTPROJ_OUT)
        dtp_codes = _qround(dtp)                                           # (M, D)

        # ---- QSScan selective scan (batch folded into lanes) -------------------------
        dt_raw = fold(dtp_codes) * S_DTPROJ_OUT + dtb2                     # (SEQ, BD)
        dt_sp = jnp.where(dt_raw > 20.0, dt_raw,
                          jnp.log(1.0 + jnp.exp(jnp.minimum(dt_raw, 20.0))))  # softplus
        u_deq = u_codes * S_XPROJ_IN
        z_deq = z_fold * S_INPROJ_OUT
        dtu = dt_sp * u_deq                                                # (SEQ, BD)

        # single fused "transpose" of [B | C] codes via one exact identity matmul
        # (int codes are exact in bf16); one MXU push instead of two.
        bc_codes = jnp.concatenate([b_codes, c_codes], axis=1)             # (M, 2N)
        r2 = lax.broadcasted_iota(jnp.int32, (2 * DSTATE, 2 * DSTATE), 0)
        cc = lax.broadcasted_iota(jnp.int32, (2 * DSTATE, 2 * DSTATE), 1)
        eye2n = (r2 == cc).astype(jnp.float32)
        bcT = lax.dot_general(eye2n, bc_codes, (((1,), (1,)), ((), ())),
                              preferred_element_type=jnp.float32)          # (2N, M)
        BqT = bcT[0:DSTATE, :] * S_B_LN_OUT                                # (N, M)
        CqT = bcT[DSTATE:2 * DSTATE, :] * S_C_LN_OUT                       # (N, M)

        def step_cols(xT, l):
            # column l (batch 0) / SEQ+l (batch 1) broadcast over that batch's channels
            c0 = jnp.broadcast_to(xT[:, l:l + 1], (DSTATE, DINNER))
            c1 = jnp.broadcast_to(xT[:, SEQ + l:SEQ + l + 1], (DSTATE, DINNER))
            return jnp.concatenate([c0, c1], axis=1)                       # (N, BD)

        # everything that does not depend on h is hoisted out of the serial loop
        dA_all = jnp.exp(A2[None, :, :] * dt_sp[:, None, :])               # (SEQ, N, BD)
        bu_list = [step_cols(BqT, l) * dtu[l:l + 1, :] for l in range(SEQ)]
        c_list = [step_cols(CqT, l) for l in range(SEQ)]

        h = jnp.zeros((DSTATE, BD), jnp.float32)                           # register state
        h_list = []
        for l in range(SEQ):          # only the recurrence itself is serial
            h = dA_all[l] * h + bu_list[l]
            h_list.append(h)

        # deferred C·h contraction: one bulk multiply + one reduction over N
        h_stack = jnp.stack(h_list, axis=0)                                # (SEQ, N, BD)
        c_stack = jnp.stack(c_list, axis=0)                                # (SEQ, N, BD)
        y = jnp.sum(c_stack * h_stack, axis=1)                             # (SEQ, BD)

        y = y + dpar2 * u_deq                                              # D skip
        y = y * (z_deq * lax.logistic(z_deq))                              # * SiLU(z)
        scan_codes = _qround(y / S_OUTPROJ_IN)                             # QAct codes

        # ---- out_proj (W8A8BF16OF16, block-diagonal folded weight) -------------------
        # lane-dense (SEQ, B*H) bf16 store; half the bytes of the old (M, H) f32 store.
        out = qmm(scan_codes, w_out_ref) * (S_OUTPROJ_IN * W_SCALE)        # (SEQ, B*H)
        o_ref[...] = out.astype(o_ref.dtype)

    return kernel


# ---------------- wrapper --------------------------------------------------------------

def _has_int8_mxu():
    """Use native int8 MXU only on v5/v6 (v7x has no integer MXU, fp8 only)."""
    try:
        kind = jax.devices()[0].device_kind.lower()
    except Exception:
        return False
    return ("v5" in kind) or ("v6" in kind)


@functools.partial(jax.jit, static_argnames=("use_int8",))
def qjamba_mamba_mixer_forward(hidden_states, packed, use_int8=False):
    B, L, H = hidden_states.shape
    assert (B, L, H) == (BATCH, SEQ, HIDDEN)
    out_fold = pl.pallas_call(
        _make_kernel(use_int8),
        out_shape=jax.ShapeDtypeStruct((SEQ, BATCH * HIDDEN), jnp.bfloat16),
    )(
        hidden_states.reshape(B * L, H).astype(jnp.float32),
        packed["w_in"], packed["w_x"], packed["w_dt"],
        packed["w_out_blk"], packed["chanpar"],
    )
    # folded output columns are [batch0 hidden | batch1 hidden]; un-fold outside the
    # kernel (tiny layout plumbing), final dtype f16 as in the reference module.
    out = out_fold.reshape(SEQ, BATCH, HIDDEN).transpose(1, 0, 2)
    return out.astype(jnp.float16)


# ---------------- host-side parameter packing ------------------------------------------

def prepare_params(params):
    """Pack the many tiny parameter tensors into 5 kernel operands (6 DMAs incl. the
    activations, down from 13): per-channel params are pre-duplicated to BD=128 lanes
    and stacked into one (16, 128) f32 array; the out_proj weight is laid out
    block-diagonally so out_proj runs in the folded (batch-in-lanes) layout."""
    dup = lambda x: jnp.concatenate([x, x], axis=-1)      # (., D) -> (., BD)

    ln_row = jnp.zeros((1, BD), jnp.float32)
    ln_row = ln_row.at[:, 0:DTRANK].set(params["w_dt_ln"])
    ln_row = ln_row.at[:, DTRANK:DTRANK + DSTATE].set(params["w_b_ln"])
    ln_row = ln_row.at[:, DTRANK + DSTATE:DTRANK + 2 * DSTATE].set(params["w_c_ln"])

    chanpar = jnp.concatenate([
        dup(params["a_neg_t"]),        # rows 0..7  : A
        dup(params["w_conv"]),         # rows 8..11 : conv taps
        dup(params["b_conv"]),         # row 12     : conv bias
        dup(params["d_par"]),          # row 13     : D
        dup(params["dt_bias"]),        # row 14     : dt bias
        ln_row,                        # row 15     : RMSNorm weights
    ], axis=0).astype(jnp.float32)
    assert chanpar.shape == (_CP_ROWS, BD)

    w_out = params["w_out_proj"]                              # (D, H) int8
    w_out_blk = jnp.zeros((BD, BATCH * HIDDEN), jnp.int8)
    w_out_blk = w_out_blk.at[0:DINNER, 0:HIDDEN].set(w_out)
    w_out_blk = w_out_blk.at[DINNER:BD, HIDDEN:2 * HIDDEN].set(w_out)

    return dict(w_in=params["w_in_proj"], w_x=params["w_x_proj"],
                w_dt=params["w_dt_proj"], w_out_blk=w_out_blk, chanpar=chanpar)


# ---------------- deterministic synthetic parameters -----------------------------------

def init_params(key):
    ks = jax.random.split(key, 10)

    def q8(k, shape):
        return jax.random.randint(k, shape, -127, 128, dtype=jnp.int32).astype(jnp.int8)

    # linear weights stored (in_features, out_features), int8 per-tensor quantized
    w_in_proj = q8(ks[0], (HIDDEN, 2 * DINNER))
    w_x_proj = q8(ks[1], (DINNER, DTRANK + 2 * DSTATE))
    w_dt_proj = q8(ks[2], (DTRANK, DINNER))
    w_out_proj = q8(ks[3], (DINNER, HIDDEN))

    w_conv = 0.1 * jax.random.normal(ks[4], (DCONV, DINNER), jnp.float32)   # depthwise taps
    b_conv = 0.1 * jax.random.normal(ks[5], (1, DINNER), jnp.float32)

    w_dt_ln = 1.0 + 0.1 * jax.random.normal(ks[6], (1, DTRANK), jnp.float32)
    w_b_ln = 1.0 + 0.1 * jax.random.normal(ks[7], (1, DSTATE), jnp.float32)
    w_c_ln = 1.0 + 0.1 * jax.random.normal(ks[8], (1, DSTATE), jnp.float32)

    dt_bias = jax.random.uniform(ks[9], (1, DINNER), jnp.float32, -3.0, 0.0)

    # A_log standard Mamba init; A = -exp(A_log), pre-transposed to (N, D)
    a_log = jnp.broadcast_to(jnp.log(jnp.arange(1, DSTATE + 1, dtype=jnp.float32)),
                             (DINNER, DSTATE))
    a_neg_t = jnp.asarray((-jnp.exp(a_log)).T)
    d_par = jnp.ones((1, DINNER), jnp.float32)

    return dict(w_in_proj=w_in_proj, w_x_proj=w_x_proj, w_dt_proj=w_dt_proj,
                w_out_proj=w_out_proj, w_conv=w_conv, b_conv=b_conv,
                w_dt_ln=w_dt_ln, w_b_ln=w_b_ln, w_c_ln=w_c_ln,
                dt_bias=dt_bias, a_neg_t=a_neg_t, d_par=d_par)


if __name__ == "__main__":
    key = jax.random.PRNGKey(0)
    pkey, xkey = jax.random.split(key)
    params = init_params(pkey)
    packed = prepare_params(params)
    hidden_states = jax.random.normal(xkey, (BATCH, SEQ, HIDDEN), jnp.float32)

    use_int8 = _has_int8_mxu()
    try:
        out = jax.block_until_ready(
            qjamba_mamba_mixer_forward(hidden_states, packed, use_int8=use_int8))
    except Exception:
        if not use_int8:
            raise
        # safe fallback to the exact bf16-codes MXU path (works on all generations)
        out = jax.block_until_ready(
            qjamba_mamba_mixer_forward(hidden_states, packed, use_int8=False))

    assert out.shape == (BATCH, SEQ, HIDDEN), out.shape
    assert out.dtype == jnp.float16, out.dtype
    assert bool(jnp.all(jnp.isfinite(out.astype(jnp.float32))))
    print("KERNEL_OK")
</pallas_src>

<mosaic_0001>
module attributes {stable_mosaic.version = 11 : i64} {
  func.func @kernel(%arg0: memref<16x32xf32, #tpu.memory_space<vmem>>, %arg1: memref<32x128xi8, #tpu.memory_space<vmem>>, %arg2: memref<64x24xi8, #tpu.memory_space<vmem>>, %arg3: memref<8x64xi8, #tpu.memory_space<vmem>>, %arg4: memref<128x64xi8, #tpu.memory_space<vmem>>, %arg5: memref<16x128xf32, #tpu.memory_space<vmem>>, %arg6: memref<8x64xbf16, #tpu.memory_space<vmem>>) attributes {dimension_semantics = [], scalar_prefetch = 0 : i64, scratch_operands = 0 : i64, tpu.core_type = #tpu.core_type<tc>} {
    %c0 = arith.constant 0 : index
    %c0_0 = arith.constant 0 : index
    %0 = vector.load %arg5[%c0, %c0_0] : memref<16x128xf32, #tpu.memory_space<vmem>>, vector<8x128xf32>
    %c8 = arith.constant 8 : index
    %c0_1 = arith.constant 0 : index
    %1 = vector.load %arg5[%c8, %c0_1] : memref<16x128xf32, #tpu.memory_space<vmem>>, vector<4x128xf32>
    %c12 = arith.constant 12 : index
    %c0_2 = arith.constant 0 : index
    %2 = vector.load %arg5[%c12, %c0_2] : memref<16x128xf32, #tpu.memory_space<vmem>>, vector<1x128xf32>
    %c13 = arith.constant 13 : index
    %c0_3 = arith.constant 0 : index
    %3 = vector.load %arg5[%c13, %c0_3] : memref<16x128xf32, #tpu.memory_space<vmem>>, vector<1x128xf32>
    %c14 = arith.constant 14 : index
    %c0_4 = arith.constant 0 : index
    %4 = vector.load %arg5[%c14, %c0_4] : memref<16x128xf32, #tpu.memory_space<vmem>>, vector<1x128xf32>
    %c15 = arith.constant 15 : index
    %c0_5 = arith.constant 0 : index
    %5 = vector.load %arg5[%c15, %c0_5] : memref<16x128xf32, #tpu.memory_space<vmem>>, vector<1x128xf32>
    %6 = vector.extract_strided_slice %5 {offsets = [0, 0], sizes = [1, 8], strides = [1, 1]} : vector<1x128xf32> to vector<1x8xf32>
    %7 = vector.extract_strided_slice %5 {offsets = [0, 8], sizes = [1, 8], strides = [1, 1]} : vector<1x128xf32> to vector<1x8xf32>
    %8 = vector.extract_strided_slice %5 {offsets = [0, 16], sizes = [1, 8], strides = [1, 1]} : vector<1x128xf32> to vector<1x8xf32>
    %c0_6 = arith.constant 0 : index
    %c0_7 = arith.constant 0 : index
    %9 = vector.load %arg0[%c0_6, %c0_7] : memref<16x32xf32, #tpu.memory_space<vmem>>, vector<16x32xf32>
    %cst = arith.constant 4.000000e-02 : f32
    %10 = vector.broadcast %cst : f32 to vector<16x32xf32>
    %11 = arith.divf %9, %10 : vector<16x32xf32>
    %12 = math.roundeven %11 : vector<16x32xf32>
    %cst_8 = arith.constant -1.280000e+02 : f32
    %cst_9 = arith.constant 1.270000e+02 : f32
    %13 = vector.broadcast %cst_8 : f32 to vector<16x32xf32>
    %14 = arith.maximumf %13, %12 : vector<16x32xf32>
    %15 = vector.broadcast %cst_9 : f32 to vector<16x32xf32>
    %16 = arith.minimumf %15, %14 : vector<16x32xf32>
    %c0_10 = arith.constant 0 : index
    %c0_11 = arith.constant 0 : index
    %17 = vector.load %arg1[%c0_10, %c0_11] : memref<32x128xi8, #tpu.memory_space<vmem>>, vector<32x128xi8>
    %18 = arith.sitofp %17 : vector<32x128xi8> to vector<32x128xf32>
    %19 = arith.truncf %18 : vector<32x128xf32> to vector<32x128xbf16>
    %20 = arith.truncf %16 : vector<16x32xf32> to vector<16x32xbf16>
    %cst_12 = arith.constant dense<0.000000e+00> : vector<16x128xf32>
    %21 = tpu.matmul %20, %19, %cst_12 {dimension_numbers = #tpu.dot_dimension_numbers<[1], [0], [0], [1], [0, 0, 1, 1], [], []>} : vector<16x32xbf16>, vector<32x128xbf16>, vector<16x128xf32> -> vector<16x128xf32>
    %cst_13 = arith.constant 4.000000e-03 : f32
    %22 = vector.broadcast %cst_13 : f32 to vector<16x128xf32>
    %23 = arith.mulf %21, %22 : vector<16x128xf32>
    %24 = math.roundeven %23 : vector<16x128xf32>
    %cst_14 = arith.constant -1.280000e+02 : f32
    %cst_15 = arith.constant 1.270000e+02 : f32
    %25 = vector.broadcast %cst_14 : f32 to vector<16x128xf32>
    %26 = arith.maximumf %25, %24 : vector<16x128xf32>
    %27 = vector.broadcast %cst_15 : f32 to vector<16x128xf32>
    %28 = arith.minimumf %27, %26 : vector<16x128xf32>
    %29 = vector.extract_strided_slice %28 {offsets = [0, 0], sizes = [16, 64], strides = [1, 1]} : vector<16x128xf32> to vector<16x64xf32>
    %30 = vector.extract_strided_slice %29 {offsets = [0, 0], sizes = [8, 64], strides = [1, 1]} : vector<16x64xf32> to vector<8x64xf32>
    %31 = vector.extract_strided_slice %29 {offsets = [8, 0], sizes = [8, 64], strides = [1, 1]} : vector<16x64xf32> to vector<8x64xf32>
    %32 = tpu.concatenate %30, %31 in 1 : vector<8x64xf32>, vector<8x64xf32> -> vector<8x128xf32>
    %33 = vector.extract_strided_slice %28 {offsets = [0, 64], sizes = [16, 64], strides = [1, 1]} : vector<16x128xf32> to vector<16x64xf32>
    %34 = vector.extract_strided_slice %33 {offsets = [0, 0], sizes = [8, 64], strides = [1, 1]} : vector<16x64xf32> to vector<8x64xf32>
    %35 = vector.extract_strided_slice %33 {offsets = [8, 0], sizes = [8, 64], strides = [1, 1]} : vector<16x64xf32> to vector<8x64xf32>
    %36 = tpu.concatenate %34, %35 in 1 : vector<8x64xf32>, vector<8x64xf32> -> vector<8x128xf32>
    %37 = tpu.iota {dimensions = array<i32: 0>} : vector<8x128xi32>
    %cst_16 = arith.constant 0.000000e+00 : f32
    %38 = vector.broadcast %cst_16 : f32 to vector<8x128xf32>
    %c3_i32 = arith.constant 3 : i32
    %39 = vector.broadcast %c3_i32 : i32 to vector<8x128xi32>
    %40 = arith.cmpi sge, %37, %39 : vector<8x128xi32>
    %c3_i32_17 = arith.constant 3 : i32
    %41 = tpu.dynamic_rotate %32 by %c3_i32_17 dim 0 : vector<8x128xf32>, i32 -> vector<8x128xf32>
    %cst_18 = arith.constant 0.000000e+00 : f32
    %42 = vector.broadcast %cst_18 : f32 to vector<8x128xf32>
    %43 = arith.select %40, %41, %42 : vector<8x128xi1>, vector<8x128xf32>
    %44 = vector.extract_strided_slice %1 {offsets = [0, 0], sizes = [1, 128], strides = [1, 1]} : vector<4x128xf32> to vector<1x128xf32>
    %45 = vector.broadcast %44 : vector<1x128xf32> to vector<8x128xf32>
    %46 = arith.mulf %45, %43 : vector<8x128xf32>
    %47 = arith.addf %38, %46 : vector<8x128xf32>
    %c2_i32 = arith.constant 2 : i32
    %48 = vector.broadcast %c2_i32 : i32 to vector<8x128xi32>
    %49 = arith.cmpi sge, %37, %48 : vector<8x128xi32>
    %c2_i32_19 = arith.constant 2 : i32
    %50 = tpu.dynamic_rotate %32 by %c2_i32_19 dim 0 : vector<8x128xf32>, i32 -> vector<8x128xf32>
    %cst_20 = arith.constant 0.000000e+00 : f32
    %51 = vector.broadcast %cst_20 : f32 to vector<8x128xf32>
    %52 = arith.select %49, %50, %51 : vector<8x128xi1>, vector<8x128xf32>
    %53 = vector.extract_strided_slice %1 {offsets = [1, 0], sizes = [1, 128], strides = [1, 1]} : vector<4x128xf32> to vector<1x128xf32>
    %54 = vector.broadcast %53 : vector<1x128xf32> to vector<8x128xf32>
    %55 = arith.mulf %54, %52 : vector<8x128xf32>
    %56 = arith.addf %47, %55 : vector<8x128xf32>
    %c1_i32 = arith.constant 1 : i32
    %57 = vector.broadcast %c1_i32 : i32 to vector<8x128xi32>
    %58 = arith.cmpi sge, %37, %57 : vector<8x128xi32>
    %c1_i32_21 = arith.constant 1 : i32
    %59 = tpu.dynamic_rotate %32 by %c1_i32_21 dim 0 : vector<8x128xf32>, i32 -> vector<8x128xf32>
    %cst_22 = arith.constant 0.000000e+00 : f32
    %60 = vector.broadcast %cst_22 : f32 to vector<8x128xf32>
    %61 = arith.select %58, %59, %60 : vector<8x128xi1>, vector<8x128xf32>
    %62 = vector.extract_strided_slice %1 {offsets = [2, 0], sizes = [1, 128], strides = [1, 1]} : vector<4x128xf32> to vector<1x128xf32>
    %63 = vector.broadcast %62 : vector<1x128xf32> to vector<8x128xf32>
    %64 = arith.mulf %63, %61 : vector<8x128xf32>
    %65 = arith.addf %56, %64 : vector<8x128xf32>
    %66 = vector.extract_strided_slice %1 {offsets = [3, 0], sizes = [1, 128], strides = [1, 1]} : vector<4x128xf32> to vector<1x128xf32>
    %67 = vector.broadcast %66 : vector<1x128xf32> to vector<8x128xf32>
    %68 = arith.mulf %67, %32 : vector<8x128xf32>
    %69 = arith.addf %65, %68 : vector<8x128xf32>
    %cst_23 = arith.constant 1.000000e-01 : f32
    %70 = vector.broadcast %cst_23 : f32 to vector<8x128xf32>
    %71 = arith.mulf %69, %70 : vector<8x128xf32>
    %72 = vector.broadcast %2 : vector<1x128xf32> to vector<8x128xf32>
    %73 = arith.addf %71, %72 : vector<8x128xf32>
    %74 = arith.negf %73 : vector<8x128xf32>
    %75 = math.exp %74 : vector<8x128xf32>
    %cst_24 = arith.constant 1.000000e+00 : f32
    %76 = vector.broadcast %cst_24 : f32 to vector<8x128xf32>
    %77 = arith.addf %76, %75 : vector<8x128xf32>
    %78 = arith.divf %76, %77 : vector<8x128xf32>
    %79 = arith.mulf %73, %78 : vector<8x128xf32>
    %cst_25 = arith.constant 3.000000e-02 : f32
    %80 = vector.broadcast %cst_25 : f32 to vector<8x128xf32>
    %81 = arith.divf %79, %80 : vector<8x128xf32>
    %82 = math.roundeven %81 : vector<8x128xf32>
    %cst_26 = arith.constant -1.280000e+02 : f32
    %cst_27 = arith.constant 1.270000e+02 : f32
    %83 = vector.broadcast %cst_26 : f32 to vector<8x128xf32>
    %84 = arith.maximumf %83, %82 : vector<8x128xf32>
    %85 = vector.broadcast %cst_27 : f32 to vector<8x128xf32>
    %86 = arith.minimumf %85, %84 : vector<8x128xf32>
    %87 = vector.extract_strided_slice %86 {offsets = [0, 0], sizes = [8, 64], strides = [1, 1]} : vector<8x128xf32> to vector<8x64xf32>
    %88 = vector.extract_strided_slice %86 {offsets = [0, 64], sizes = [8, 64], strides = [1, 1]} : vector<8x128xf32> to vector<8x64xf32>
    %89 = tpu.concatenate %87, %88 in 0 : vector<8x64xf32>, vector<8x64xf32> -> vector<16x64xf32>
    %c0_28 = arith.constant 0 : index
    %c0_29 = arith.constant 0 : index
    %90 = vector.load %arg2[%c0_28, %c0_29] : memref<64x24xi8, #tpu.memory_space<vmem>>, vector<64x24xi8>
    %91 = arith.sitofp %90 : vector<64x24xi8> to vector<64x24xf32>
    %92 = arith.truncf %91 : vector<64x24xf32> to vector<64x24xbf16>
    %93 = arith.truncf %89 : vector<16x64xf32> to vector<16x64xbf16>
    %cst_30 = arith.constant dense<0.000000e+00> : vector<16x24xf32>
    %94 = tpu.matmul %93, %92, %cst_30 {dimension_numbers = #tpu.dot_dimension_numbers<[1], [0], [0], [1], [0, 0, 1, 1], [], []>} : vector<16x64xbf16>, vector<64x24xbf16>, vector<16x24xf32> -> vector<16x24xf32>
    %cst_31 = arith.constant 3.000000e-04 : f32
    %95 = vector.broadcast %cst_31 : f32 to vector<16x24xf32>
    %96 = arith.mulf %94, %95 : vector<16x24xf32>
    %97 = vector.extract_strided_slice %96 {offsets = [0, 0], sizes = [16, 8], strides = [1, 1]} : vector<16x24xf32> to vector<16x8xf32>
    %98 = arith.mulf %97, %97 : vector<16x8xf32>
    %cst_32 = arith.constant dense<0.000000e+00> : vector<16xf32>
    %99 = vector.multi_reduction <add>, %98, %cst_32 [1] : vector<16x8xf32> to vector<16xf32>
    %100 = vector.shape_cast %99 : vector<16xf32> to vector<16x1xf32>
    %cst_33 = arith.constant 8.000000e+00 : f32
    %101 = vector.broadcast %cst_33 : f32 to vector<16x1xf32>
    %102 = arith.divf %100, %101 : vector<16x1xf32>
    %cst_34 = arith.constant 9.99999997E-7 : f32
    %103 = vector.broadcast %cst_34 : f32 to vector<16x1xf32>
    %104 = arith.addf %102, %103 : vector<16x1xf32>
    %105 = math.rsqrt %104 : vector<16x1xf32>
    %106 = vector.broadcast %105 : vector<16x1xf32> to vector<16x8xf32>
    %107 = arith.mulf %97, %106 : vector<16x8xf32>
    %108 = vector.broadcast %6 : vector<1x8xf32> to vector<16x8xf32>
    %109 = arith.mulf %108, %107 : vector<16x8xf32>
    %cst_35 = arith.constant 2.000000e-02 : f32
    %110 = vector.broadcast %cst_35 : f32 to vector<16x8xf32>
    %111 = arith.divf %109, %110 : vector<16x8xf32>
    %112 = math.roundeven %111 : vector<16x8xf32>
    %cst_36 = arith.constant -1.280000e+02 : f32
    %cst_37 = arith.constant 1.270000e+02 : f32
    %113 = vector.broadcast %cst_36 : f32 to vector<16x8xf32>
    %114 = arith.maximumf %113, %112 : vector<16x8xf32>
    %115 = vector.broadcast %cst_37 : f32 to vector<16x8xf32>
    %116 = arith.minimumf %115, %114 : vector<16x8xf32>
    %117 = vector.extract_strided_slice %96 {offsets = [0, 8], sizes = [16, 8], strides = [1, 1]} : vector<16x24xf32> to vector<16x8xf32>
    %118 = arith.mulf %117, %117 : vector<16x8xf32>
    %cst_38 = arith.constant dense<0.000000e+00> : vector<16xf32>
    %119 = vector.multi_reduction <add>, %118, %cst_38 [1] : vector<16x8xf32> to vector<16xf32>
    %120 = vector.shape_cast %119 : vector<16xf32> to vector<16x1xf32>
    %cst_39 = arith.constant 8.000000e+00 : f32
    %121 = vector.broadcast %cst_39 : f32 to vector<16x1xf32>
    %122 = arith.divf %120, %121 : vector<16x1xf32>
    %cst_40 = arith.constant 9.99999997E-7 : f32
    %123 = vector.broadcast %cst_40 : f32 to vector<16x1xf32>
    %124 = arith.addf %122, %123 : vector<16x1xf32>
    %125 = math.rsqrt %124 : vector<16x1xf32>
    %126 = vector.broadcast %125 : vector<16x1xf32> to vector<16x8xf32>
    %127 = arith.mulf %117, %126 : vector<16x8xf32>
    %128 = vector.broadcast %7 : vector<1x8xf32> to vector<16x8xf32>
    %129 = arith.mulf %128, %127 : vector<16x8xf32>
    %cst_41 = arith.constant 2.000000e-02 : f32
    %130 = vector.broadcast %cst_41 : f32 to vector<16x8xf32>
    %131 = arith.divf %129, %130 : vector<16x8xf32>
    %132 = math.roundeven %131 : vector<16x8xf32>
    %cst_42 = arith.constant -1.280000e+02 : f32
    %cst_43 = arith.constant 1.270000e+02 : f32
    %133 = vector.broadcast %cst_42 : f32 to vector<16x8xf32>
    %134 = arith.maximumf %133, %132 : vector<16x8xf32>
    %135 = vector.broadcast %cst_43 : f32 to vector<16x8xf32>
    %136 = arith.minimumf %135, %134 : vector<16x8xf32>
    %137 = vector.extract_strided_slice %96 {offsets = [0, 16], sizes = [16, 8], strides = [1, 1]} : vector<16x24xf32> to vector<16x8xf32>
    %138 = arith.mulf %137, %137 : vector<16x8xf32>
    %cst_44 = arith.constant dense<0.000000e+00> : vector<16xf32>
    %139 = vector.multi_reduction <add>, %138, %cst_44 [1] : vector<16x8xf32> to vector<16xf32>
    %140 = vector.shape_cast %139 : vector<16xf32> to vector<16x1xf32>
    %cst_45 = arith.constant 8.000000e+00 : f32
    %141 = vector.broadcast %cst_45 : f32 to vector<16x1xf32>
    %142 = arith.divf %140, %141 : vector<16x1xf32>
    %cst_46 = arith.constant 9.99999997E-7 : f32
    %143 = vector.broadcast %cst_46 : f32 to vector<16x1xf32>
    %144 = arith.addf %142, %143 : vector<16x1xf32>
    %145 = math.rsqrt %144 : vector<16x1xf32>
    %146 = vector.broadcast %145 : vector<16x1xf32> to vector<16x8xf32>
    %147 = arith.mulf %137, %146 : vector<16x8xf32>
    %148 = vector.broadcast %8 : vector<1x8xf32> to vector<16x8xf32>
    %149 = arith.mulf %148, %147 : vector<16x8xf32>
    %cst_47 = arith.constant 2.000000e-02 : f32
    %150 = vector.broadcast %cst_47 : f32 to vector<16x8xf32>
    %151 = arith.divf %149, %150 : vector<16x8xf32>
    %152 = math.roundeven %151 : vector<16x8xf32>
    %cst_48 = arith.constant -1.280000e+02 : f32
    %cst_49 = arith.constant 1.270000e+02 : f32
    %153 = vector.broadcast %cst_48 : f32 to vector<16x8xf32>
    %154 = arith.maximumf %153, %152 : vector<16x8xf32>
    %155 = vector.broadcast %cst_49 : f32 to vector<16x8xf32>
    %156 = arith.minimumf %155, %154 : vector<16x8xf32>
    %c0_50 = arith.constant 0 : index
    %c0_51 = arith.constant 0 : index
    %157 = vector.load %arg3[%c0_50, %c0_51] : memref<8x64xi8, #tpu.memory_space<vmem>>, vector<8x64xi8>
    %158 = arith.sitofp %157 : vector<8x64xi8> to vector<8x64xf32>
    %159 = arith.truncf %158 : vector<8x64xf32> to vector<8x64xbf16>
    %160 = arith.truncf %116 : vector<16x8xf32> to vector<16x8xbf16>
    %cst_52 = arith.constant dense<0.000000e+00> : vector<16x64xf32>
    %161 = tpu.matmul %160, %159, %cst_52 {dimension_numbers = #tpu.dot_dimension_numbers<[1], [0], [0], [1], [0, 0, 1, 1], [], []>} : vector<16x8xbf16>, vector<8x64xbf16>, vector<16x64xf32> -> vector<16x64xf32>
    %cst_53 = arith.constant 0.00666666683 : f32
    %162 = vector.broadcast %cst_53 : f32 to vector<16x64xf32>
    %163 = arith.mulf %161, %162 : vector<16x64xf32>
    %164 = math.roundeven %163 : vector<16x64xf32>
    %cst_54 = arith.constant -1.280000e+02 : f32
    %cst_55 = arith.constant 1.270000e+02 : f32
    %165 = vector.broadcast %cst_54 : f32 to vector<16x64xf32>
    %166 = arith.maximumf %165, %164 : vector<16x64xf32>
    %167 = vector.broadcast %cst_55 : f32 to vector<16x64xf32>
    %168 = arith.minimumf %167, %166 : vector<16x64xf32>
    %169 = vector.extract_strided_slice %168 {offsets = [0, 0], sizes = [8, 64], strides = [1, 1]} : vector<16x64xf32> to vector<8x64xf32>
    %170 = vector.extract_strided_slice %168 {offsets = [8, 0], sizes = [8, 64], strides = [1, 1]} : vector<16x64xf32> to vector<8x64xf32>
    %171 = tpu.concatenate %169, %170 in 1 : vector<8x64xf32>, vector<8x64xf32> -> vector<8x128xf32>
    %cst_56 = arith.constant 3.000000e-02 : f32
    %172 = vector.broadcast %cst_56 : f32 to vector<8x128xf32>
    %173 = arith.mulf %171, %172 : vector<8x128xf32>
    %174 = vector.broadcast %4 : vector<1x128xf32> to vector<8x128xf32>
    %175 = arith.addf %173, %174 : vector<8x128xf32>
    %cst_57 = arith.constant 2.000000e+01 : f32
    %176 = vector.broadcast %cst_57 : f32 to vector<8x128xf32>
    %177 = arith.cmpf ogt, %175, %176 : vector<8x128xf32>
    %cst_58 = arith.constant 2.000000e+01 : f32
    %178 = vector.broadcast %cst_58 : f32 to vector<8x128xf32>
    %179 = arith.minimumf %175, %178 : vector<8x128xf32>
    %180 = math.exp %179 : vector<8x128xf32>
    %cst_59 = arith.constant 1.000000e+00 : f32
    %181 = vector.broadcast %cst_59 : f32 to vector<8x128xf32>
    %182 = arith.addf %181, %180 : vector<8x128xf32>
    %183 = math.log %182 : vector<8x128xf32>
    %184 = arith.select %177, %175, %183 : vector<8x128xi1>, vector<8x128xf32>
    %cst_60 = arith.constant 3.000000e-02 : f32
    %185 = vector.broadcast %cst_60 : f32 to vector<8x128xf32>
    %186 = arith.mulf %86, %185 : vector<8x128xf32>
    %cst_61 = arith.constant 1.000000e-01 : f32
    %187 = vector.broadcast %cst_61 : f32 to vector<8x128xf32>
    %188 = arith.mulf %36, %187 : vector<8x128xf32>
    %189 = arith.mulf %184, %186 : vector<8x128xf32>
    %190 = tpu.concatenate %136, %156 in 1 : vector<16x8xf32>, vector<16x8xf32> -> vector<16x16xf32>
    %191 = tpu.iota {dimensions = array<i32: 0>} : vector<16x16xi32>
    %192 = tpu.iota {dimensions = array<i32: 1>} : vector<16x16xi32>
    %193 = arith.cmpi eq, %191, %192 : vector<16x16xi32>
    %194 = arith.extui %193 : vector<16x16xi1> to vector<16x16xi32>
    %195 = arith.sitofp %194 : vector<16x16xi32> to vector<16x16xf32>
    %cst_62 = arith.constant dense<0.000000e+00> : vector<16x16xf32>
    %196 = tpu.matmul %195, %190, %cst_62 {dimension_numbers = #tpu.dot_dimension_numbers<[1], [1], [0], [0], [0, 0, 1, 0], [], []>} : vector<16x16xf32>, vector<16x16xf32>, vector<16x16xf32> -> vector<16x16xf32>
    %197 = vector.extract_strided_slice %196 {offsets = [0, 0], sizes = [8, 16], strides = [1, 1]} : vector<16x16xf32> to vector<8x16xf32>
    %cst_63 = arith.constant 2.000000e-02 : f32
    %198 = vector.broadcast %cst_63 : f32 to vector<8x16xf32>
    %199 = arith.mulf %197, %198 : vector<8x16xf32>
    %200 = vector.extract_strided_slice %196 {offsets = [8, 0], sizes = [8, 16], strides = [1, 1]} : vector<16x16xf32> to vector<8x16xf32>
    %cst_64 = arith.constant 2.000000e-02 : f32
    %201 = vector.broadcast %cst_64 : f32 to vector<8x16xf32>
    %202 = arith.mulf %200, %201 : vector<8x16xf32>
    %203 = vector.shape_cast %0 : vector<8x128xf32> to vector<1x8x128xf32>
    %204 = vector.shape_cast %184 : vector<8x128xf32> to vector<8x1x128xf32>
    %205 = vector.broadcast %203 : vector<1x8x128xf32> to vector<8x8x128xf32>
    %206 = vector.broadcast %204 : vector<8x1x128xf32> to vector<8x8x128xf32>
    %207 = arith.mulf %205, %206 : vector<8x8x128xf32>
    %208 = math.exp %207 : vector<8x8x128xf32>
    %209 = vector.extract_strided_slice %199 {offsets = [0, 0], sizes = [8, 1], strides = [1, 1]} : vector<8x16xf32> to vector<8x1xf32>
    %210 = vector.shape_cast %209 : vector<8x1xf32> to vector<8x1xf32>
    %211 = vector.broadcast %210 : vector<8x1xf32> to vector<8x64xf32>
    %212 = vector.extract_strided_slice %199 {offsets = [0, 8], sizes = [8, 1], strides = [1, 1]} : vector<8x16xf32> to vector<8x1xf32>
    %213 = vector.shape_cast %212 : vector<8x1xf32> to vector<8x1xf32>
    %214 = vector.broadcast %213 : vector<8x1xf32> to vector<8x64xf32>
    %215 = tpu.concatenate %211, %214 in 1 : vector<8x64xf32>, vector<8x64xf32> -> vector<8x128xf32>
    %216 = vector.extract_strided_slice %189 {offsets = [0, 0], sizes = [1, 128], strides = [1, 1]} : vector<8x128xf32> to vector<1x128xf32>
    %217 = vector.broadcast %216 : vector<1x128xf32> to vector<8x128xf32>
    %218 = arith.mulf %215, %217 : vector<8x128xf32>
    %219 = vector.extract_strided_slice %199 {offsets = [0, 1], sizes = [8, 1], strides = [1, 1]} : vector<8x16xf32> to vector<8x1xf32>
    %220 = vector.shape_cast %219 : vector<8x1xf32> to vector<8x1xf32>
    %221 = vector.broadcast %220 : vector<8x1xf32> to vector<8x64xf32>
    %222 = vector.extract_strided_slice %199 {offsets = [0, 9], sizes = [8, 1], strides = [1, 1]} : vector<8x16xf32> to vector<8x1xf32>
    %223 = vector.shape_cast %222 : vector<8x1xf32> to vector<8x1xf32>
    %224 = vector.broadcast %223 : vector<8x1xf32> to vector<8x64xf32>
    %225 = tpu.concatenate %221, %224 in 1 : vector<8x64xf32>, vector<8x64xf32> -> vector<8x128xf32>
    %226 = vector.extract_strided_slice %189 {offsets = [1, 0], sizes = [1, 128], strides = [1, 1]} : vector<8x128xf32> to vector<1x128xf32>
    %227 = vector.broadcast %226 : vector<1x128xf32> to vector<8x128xf32>
    %228 = arith.mulf %225, %227 : vector<8x128xf32>
    %229 = vector.extract_strided_slice %199 {offsets = [0, 2], sizes = [8, 1], strides = [1, 1]} : vector<8x16xf32> to vector<8x1xf32>
    %230 = vector.shape_cast %229 : vector<8x1xf32> to vector<8x1xf32>
    %231 = vector.broadcast %230 : vector<8x1xf32> to vector<8x64xf32>
    %232 = vector.extract_strided_slice %199 {offsets = [0, 10], sizes = [8, 1], strides = [1, 1]} : vector<8x16xf32> to vector<8x1xf32>
    %233 = vector.shape_cast %232 : vector<8x1xf32> to vector<8x1xf32>
    %234 = vector.broadcast %233 : vector<8x1xf32> to vector<8x64xf32>
    %235 = tpu.concatenate %231, %234 in 1 : vector<8x64xf32>, vector<8x64xf32> -> vector<8x128xf32>
    %236 = vector.extract_strided_slice %189 {offsets = [2, 0], sizes = [1, 128], strides = [1, 1]} : vector<8x128xf32> to vector<1x128xf32>
    %237 = vector.broadcast %236 : vector<1x128xf32> to vector<8x128xf32>
    %238 = arith.mulf %235, %237 : vector<8x128xf32>
    %239 = vector.extract_strided_slice %199 {offsets = [0, 3], sizes = [8, 1], strides = [1, 1]} : vector<8x16xf32> to vector<8x1xf32>
    %240 = vector.shape_cast %239 : vector<8x1xf32> to vector<8x1xf32>
    %241 = vector.broadcast %240 : vector<8x1xf32> to vector<8x64xf32>
    %242 = vector.extract_strided_slice %199 {offsets = [0, 11], sizes = [8, 1], strides = [1, 1]} : vector<8x16xf32> to vector<8x1xf32>
    %243 = vector.shape_cast %242 : vector<8x1xf32> to vector<8x1xf32>
    %244 = vector.broadcast %243 : vector<8x1xf32> to vector<8x64xf32>
    %245 = tpu.concatenate %241, %244 in 1 : vector<8x64xf32>, vector<8x64xf32> -> vector<8x128xf32>
    %246 = vector.extract_strided_slice %189 {offsets = [3, 0], sizes = [1, 128], strides = [1, 1]} : vector<8x128xf32> to vector<1x128xf32>
    %247 = vector.broadcast %246 : vector<1x128xf32> to vector<8x128xf32>
    %248 = arith.mulf %245, %247 : vector<8x128xf32>
    %249 = vector.extract_strided_slice %199 {offsets = [0, 4], sizes = [8, 1], strides = [1, 1]} : vector<8x16xf32> to vector<8x1xf32>
    %250 = vector.shape_cast %249 : vector<8x1xf32> to vector<8x1xf32>
    %251 = vector.broadcast %250 : vector<8x1xf32> to vector<8x64xf32>
    %252 = vector.extract_strided_slice %199 {offsets = [0, 12], sizes = [8, 1], strides = [1, 1]} : vector<8x16xf32> to vector<8x1xf32>
    %253 = vector.shape_cast %252 : vector<8x1xf32> to vector<8x1xf32>
    %254 = vector.broadcast %253 : vector<8x1xf32> to vector<8x64xf32>
    %255 = tpu.concatenate %251, %254 in 1 : vector<8x64xf32>, vector<8x64xf32> -> vector<8x128xf32>
    %256 = vector.extract_strided_slice %189 {offsets = [4, 0], sizes = [1, 128], strides = [1, 1]} : vector<8x128xf32> to vector<1x128xf32>
    %257 = vector.broadcast %256 : vector<1x128xf32> to vector<8x128xf32>
    %258 = arith.mulf %255, %257 : vector<8x128xf32>
    %259 = vector.extract_strided_slice %199 {offsets = [0, 5], sizes = [8, 1], strides = [1, 1]} : vector<8x16xf32> to vector<8x1xf32>
    %260 = vector.shape_cast %259 : vector<8x1xf32> to vector<8x1xf32>
    %261 = vector.broadcast %260 : vector<8x1xf32> to vector<8x64xf32>
    %262 = vector.extract_strided_slice %199 {offsets = [0, 13], sizes = [8, 1], strides = [1, 1]} : vector<8x16xf32> to vector<8x1xf32>
    %263 = vector.shape_cast %262 : vector<8x1xf32> to vector<8x1xf32>
    %264 = vector.broadcast %263 : vector<8x1xf32> to vector<8x64xf32>
    %265 = tpu.concatenate %261, %264 in 1 : vector<8x64xf32>, vector<8x64xf32> -> vector<8x128xf32>
    %266 = vector.extract_strided_slice %189 {offsets = [5, 0], sizes = [1, 128], strides = [1, 1]} : vector<8x128xf32> to vector<1x128xf32>
    %267 = vector.broadcast %266 : vector<1x128xf32> to vector<8x128xf32>
    %268 = arith.mulf %265, %267 : vector<8x128xf32>
    %269 = vector.extract_strided_slice %199 {offsets = [0, 6], sizes = [8, 1], strides = [1, 1]} : vector<8x16xf32> to vector<8x1xf32>
    %270 = vector.shape_cast %269 : vector<8x1xf32> to vector<8x1xf32>
    %271 = vector.broadcast %270 : vector<8x1xf32> to vector<8x64xf32>
    %272 = vector.extract_strided_slice %199 {offsets = [0, 14], sizes = [8, 1], strides = [1, 1]} : vector<8x16xf32> to vector<8x1xf32>
    %273 = vector.shape_cast %272 : vector<8x1xf32> to vector<8x1xf32>
    %274 = vector.broadcast %273 : vector<8x1xf32> to vector<8x64xf32>
    %275 = tpu.concatenate %271, %274 in 1 : vector<8x64xf32>, vector<8x64xf32> -> vector<8x128xf32>
    %276 = vector.extract_strided_slice %189 {offsets = [6, 0], sizes = [1, 128], strides = [1, 1]} : vector<8x128xf32> to vector<1x128xf32>
    %277 = vector.broadcast %276 : vector<1x128xf32> to vector<8x128xf32>
    %278 = arith.mulf %275, %277 : vector<8x128xf32>
    %279 = vector.extract_strided_slice %199 {offsets = [0, 7], sizes = [8, 1], strides = [1, 1]} : vector<8x16xf32> to vector<8x1xf32>
    %280 = vector.shape_cast %279 : vector<8x1xf32> to vector<8x1xf32>
    %281 = vector.broadcast %280 : vector<8x1xf32> to vector<8x64xf32>
    %282 = vector.extract_strided_slice %199 {offsets = [0, 15], sizes = [8, 1], strides = [1, 1]} : vector<8x16xf32> to vector<8x1xf32>
    %283 = vector.shape_cast %282 : vector<8x1xf32> to vector<8x1xf32>
    %284 = vector.broadcast %283 : vector<8x1xf32> to vector<8x64xf32>
    %285 = tpu.concatenate %281, %284 in 1 : vector<8x64xf32>, vector<8x64xf32> -> vector<8x128xf32>
    %286 = vector.extract_strided_slice %189 {offsets = [7, 0], sizes = [1, 128], strides = [1, 1]} : vector<8x128xf32> to vector<1x128xf32>
    %287 = vector.broadcast %286 : vector<1x128xf32> to vector<8x128xf32>
    %288 = arith.mulf %285, %287 : vector<8x128xf32>
    %289 = vector.extract_strided_slice %202 {offsets = [0, 0], sizes = [8, 1], strides = [1, 1]} : vector<8x16xf32> to vector<8x1xf32>
    %290 = vector.shape_cast %289 : vector<8x1xf32> to vector<8x1xf32>
    %291 = vector.broadcast %290 : vector<8x1xf32> to vector<8x64xf32>
    %292 = vector.extract_strided_slice %202 {offsets = [0, 8], sizes = [8, 1], strides = [1, 1]} : vector<8x16xf32> to vector<8x1xf32>
    %293 = vector.shape_cast %292 : vector<8x1xf32> to vector<8x1xf32>
    %294 = vector.broadcast %293 : vector<8x1xf32> to vector<8x64xf32>
    %295 = tpu.concatenate %291, %294 in 1 : vector<8x64xf32>, vector<8x64xf32> -> vector<8x128xf32>
    %296 = vector.extract_strided_slice %202 {offsets = [0, 1], sizes = [8, 1], strides = [1, 1]} : vector<8x16xf32> to vector<8x1xf32>
    %297 = vector.shape_cast %296 : vector<8x1xf32> to vector<8x1xf32>
    %298 = vector.broadcast %297 : vector<8x1xf32> to vector<8x64xf32>
    %299 = vector.extract_strided_slice %202 {offsets = [0, 9], sizes = [8, 1], strides = [1, 1]} : vector<8x16xf32> to vector<8x1xf32>
    %300 = vector.shape_cast %299 : vector<8x1xf32> to vector<8x1xf32>
    %301 = vector.broadcast %300 : vector<8x1xf32> to vector<8x64xf32>
    %302 = tpu.concatenate %298, %301 in 1 : vector<8x64xf32>, vector<8x64xf32> -> vector<8x128xf32>
    %303 = vector.extract_strided_slice %202 {offsets = [0, 2], sizes = [8, 1], strides = [1, 1]} : vector<8x16xf32> to vector<8x1xf32>
    %304 = vector.shape_cast %303 : vector<8x1xf32> to vector<8x1xf32>
    %305 = vector.broadcast %304 : vector<8x1xf32> to vector<8x64xf32>
    %306 = vector.extract_strided_slice %202 {offsets = [0, 10], sizes = [8, 1], strides = [1, 1]} : vector<8x16xf32> to vector<8x1xf32>
    %307 = vector.shape_cast %306 : vector<8x1xf32> to vector<8x1xf32>
    %308 = vector.broadcast %307 : vector<8x1xf32> to vector<8x64xf32>
    %309 = tpu.concatenate %305, %308 in 1 : vector<8x64xf32>, vector<8x64xf32> -> vector<8x128xf32>
    %310 = vector.extract_strided_slice %202 {offsets = [0, 3], sizes = [8, 1], strides = [1, 1]} : vector<8x16xf32> to vector<8x1xf32>
    %311 = vector.shape_cast %310 : vector<8x1xf32> to vector<8x1xf32>
    %312 = vector.broadcast %311 : vector<8x1xf32> to vector<8x64xf32>
    %313 = vector.extract_strided_slice %202 {offsets = [0, 11], sizes = [8, 1], strides = [1, 1]} : vector<8x16xf32> to vector<8x1xf32>
    %314 = vector.shape_cast %313 : vector<8x1xf32> to vector<8x1xf32>
    %315 = vector.broadcast %314 : vector<8x1xf32> to vector<8x64xf32>
    %316 = tpu.concatenate %312, %315 in 1 : vector<8x64xf32>, vector<8x64xf32> -> vector<8x128xf32>
    %317 = vector.extract_strided_slice %202 {offsets = [0, 4], sizes = [8, 1], strides = [1, 1]} : vector<8x16xf32> to vector<8x1xf32>
    %318 = vector.shape_cast %317 : vector<8x1xf32> to vector<8x1xf32>
    %319 = vector.broadcast %318 : vector<8x1xf32> to vector<8x64xf32>
    %320 = vector.extract_strided_slice %202 {offsets = [0, 12], sizes = [8, 1], strides = [1, 1]} : vector<8x16xf32> to vector<8x1xf32>
    %321 = vector.shape_cast %320 : vector<8x1xf32> to vector<8x1xf32>
    %322 = vector.broadcast %321 : vector<8x1xf32> to vector<8x64xf32>
    %323 = tpu.concatenate %319, %322 in 1 : vector<8x64xf32>, vector<8x64xf32> -> vector<8x128xf32>
    %324 = vector.extract_strided_slice %202 {offsets = [0, 5], sizes = [8, 1], strides = [1, 1]} : vector<8x16xf32> to vector<8x1xf32>
    %325 = vector.shape_cast %324 : vector<8x1xf32> to vector<8x1xf32>
    %326 = vector.broadcast %325 : vector<8x1xf32> to vector<8x64xf32>
    %327 = vector.extract_strided_slice %202 {offsets = [0, 13], sizes = [8, 1], strides = [1, 1]} : vector<8x16xf32> to vector<8x1xf32>
    %328 = vector.shape_cast %327 : vector<8x1xf32> to vector<8x1xf32>
    %329 = vector.broadcast %328 : vector<8x1xf32> to vector<8x64xf32>
    %330 = tpu.concatenate %326, %329 in 1 : vector<8x64xf32>, vector<8x64xf32> -> vector<8x128xf32>
    %331 = vector.extract_strided_slice %202 {offsets = [0, 6], sizes = [8, 1], strides = [1, 1]} : vector<8x16xf32> to vector<8x1xf32>
    %332 = vector.shape_cast %331 : vector<8x1xf32> to vector<8x1xf32>
    %333 = vector.broadcast %332 : vector<8x1xf32> to vector<8x64xf32>
    %334 = vector.extract_strided_slice %202 {offsets = [0, 14], sizes = [8, 1], strides = [1, 1]} : vector<8x16xf32> to vector<8x1xf32>
    %335 = vector.shape_cast %334 : vector<8x1xf32> to vector<8x1xf32>
    %336 = vector.broadcast %335 : vector<8x1xf32> to vector<8x64xf32>
    %337 = tpu.concatenate %333, %336 in 1 : vector<8x64xf32>, vector<8x64xf32> -> vector<8x128xf32>
    %338 = vector.extract_strided_slice %202 {offsets = [0, 7], sizes = [8, 1], strides = [1, 1]} : vector<8x16xf32> to vector<8x1xf32>
    %339 = vector.shape_cast %338 : vector<8x1xf32> to vector<8x1xf32>
    %340 = vector.broadcast %339 : vector<8x1xf32> to vector<8x64xf32>
    %341 = vector.extract_strided_slice %202 {offsets = [0, 15], sizes = [8, 1], strides = [1, 1]} : vector<8x16xf32> to vector<8x1xf32>
    %342 = vector.shape_cast %341 : vector<8x1xf32> to vector<8x1xf32>
    %343 = vector.broadcast %342 : vector<8x1xf32> to vector<8x64xf32>
    %344 = tpu.concatenate %340, %343 in 1 : vector<8x64xf32>, vector<8x64xf32> -> vector<8x128xf32>
    %cst_65 = arith.constant 0.000000e+00 : f32
    %345 = vector.broadcast %cst_65 : f32 to vector<8x128xf32>
    %346 = vector.extract_strided_slice %208 {offsets = [0, 0, 0], sizes = [1, 8, 128], strides = [1, 1, 1]} : vector<8x8x128xf32> to vector<1x8x128xf32>
    %347 = vector.shape_cast %346 : vector<1x8x128xf32> to vector<8x128xf32>
    %348 = arith.mulf %347, %345 : vector<8x128xf32>
    %349 = arith.addf %348, %218 : vector<8x128xf32>
    %350 = vector.extract_strided_slice %208 {offsets = [1, 0, 0], sizes = [1, 8, 128], strides = [1, 1, 1]} : vector<8x8x128xf32> to vector<1x8x128xf32>
    %351 = vector.shape_cast %350 : vector<1x8x128xf32> to vector<8x128xf32>
    %352 = arith.mulf %351, %349 : vector<8x128xf32>
    %353 = arith.addf %352, %228 : vector<8x128xf32>
    %354 = vector.extract_strided_slice %208 {offsets = [2, 0, 0], sizes = [1, 8, 128], strides = [1, 1, 1]} : vector<8x8x128xf32> to vector<1x8x128xf32>
    %355 = vector.shape_cast %354 : vector<1x8x128xf32> to vector<8x128xf32>
    %356 = arith.mulf %355, %353 : vector<8x128xf32>
    %357 = arith.addf %356, %238 : vector<8x128xf32>
    %358 = vector.extract_strided_slice %208 {offsets = [3, 0, 0], sizes = [1, 8, 128], strides = [1, 1, 1]} : vector<8x8x128xf32> to vector<1x8x128xf32>
    %359 = vector.shape_cast %358 : vector<1x8x128xf32> to vector<8x128xf32>
    %360 = arith.mulf %359, %357 : vector<8x128xf32>
    %361 = arith.addf %360, %248 : vector<8x128xf32>
    %362 = vector.extract_strided_slice %208 {offsets = [4, 0, 0], sizes = [1, 8, 128], strides = [1, 1, 1]} : vector<8x8x128xf32> to vector<1x8x128xf32>
    %363 = vector.shape_cast %362 : vector<1x8x128xf32> to vector<8x128xf32>
    %364 = arith.mulf %363, %361 : vector<8x128xf32>
    %365 = arith.addf %364, %258 : vector<8x128xf32>
    %366 = vector.extract_strided_slice %208 {offsets = [5, 0, 0], sizes = [1, 8, 128], strides = [1, 1, 1]} : vector<8x8x128xf32> to vector<1x8x128xf32>
    %367 = vector.shape_cast %366 : vector<1x8x128xf32> to vector<8x128xf32>
    %368 = arith.mulf %367, %365 : vector<8x128xf32>
    %369 = arith.addf %368, %268 : vector<8x128xf32>
    %370 = vector.extract_strided_slice %208 {offsets = [6, 0, 0], sizes = [1, 8, 128], strides = [1, 1, 1]} : vector<8x8x128xf32> to vector<1x8x128xf32>
    %371 = vector.shape_cast %370 : vector<1x8x128xf32> to vector<8x128xf32>
    %372 = arith.mulf %371, %369 : vector<8x128xf32>
    %373 = arith.addf %372, %278 : vector<8x128xf32>
    %374 = vector.extract_strided_slice %208 {offsets = [7, 0, 0], sizes = [1, 8, 128], strides = [1, 1, 1]} : vector<8x8x128xf32> to vector<1x8x128xf32>
    %375 = vector.shape_cast %374 : vector<1x8x128xf32> to vector<8x128xf32>
    %376 = arith.mulf %375, %373 : vector<8x128xf32>
    %377 = arith.addf %376, %288 : vector<8x128xf32>
    %378 = vector.shape_cast %349 : vector<8x128xf32> to vector<1x8x128xf32>
    %379 = vector.shape_cast %353 : vector<8x128xf32> to vector<1x8x128xf32>
    %380 = vector.shape_cast %357 : vector<8x128xf32> to vector<1x8x128xf32>
    %381 = vector.shape_cast %361 : vector<8x128xf32> to vector<1x8x128xf32>
    %382 = vector.shape_cast %365 : vector<8x128xf32> to vector<1x8x128xf32>
    %383 = vector.shape_cast %369 : vector<8x128xf32> to vector<1x8x128xf32>
    %384 = vector.shape_cast %373 : vector<8x128xf32> to vector<1x8x128xf32>
    %385 = vector.shape_cast %377 : vector<8x128xf32> to vector<1x8x128xf32>
    %386 = tpu.concatenate %378, %379, %380, %381, %382, %383, %384, %385 in 0 : vector<1x8x128xf32>, vector<1x8x128xf32>, vector<1x8x128xf32>, vector<1x8x128xf32>, vector<1x8x128xf32>, vector<1x8x128xf32>, vector<1x8x128xf32>, vector<1x8x128xf32> -> vector<8x8x128xf32>
    %387 = vector.shape_cast %295 : vector<8x128xf32> to vector<1x8x128xf32>
    %388 = vector.shape_cast %302 : vector<8x128xf32> to vector<1x8x128xf32>
    %389 = vector.shape_cast %309 : vector<8x128xf32> to vector<1x8x128xf32>
    %390 = vector.shape_cast %316 : vector<8x128xf32> to vector<1x8x128xf32>
    %391 = vector.shape_cast %323 : vector<8x128xf32> to vector<1x8x128xf32>
    %392 = vector.shape_cast %330 : vector<8x128xf32> to vector<1x8x128xf32>
    %393 = vector.shape_cast %337 : vector<8x128xf32> to vector<1x8x128xf32>
    %394 = vector.shape_cast %344 : vector<8x128xf32> to vector<1x8x128xf32>
    %395 = tpu.concatenate %387, %388, %389, %390, %391, %392, %393, %394 in 0 : vector<1x8x128xf32>, vector<1x8x128xf32>, vector<1x8x128xf32>, vector<1x8x128xf32>, vector<1x8x128xf32>, vector<1x8x128xf32>, vector<1x8x128xf32>, vector<1x8x128xf32> -> vector<8x8x128xf32>
    %396 = arith.mulf %395, %386 : vector<8x8x128xf32>
    %cst_66 = arith.constant dense<0.000000e+00> : vector<8x128xf32>
    %397 = vector.multi_reduction <add>, %396, %cst_66 [1] : vector<8x8x128xf32> to vector<8x128xf32>
    %398 = vector.broadcast %3 : vector<1x128xf32> to vector<8x128xf32>
    %399 = arith.mulf %398, %186 : vector<8x128xf32>
    %400 = arith.addf %397, %399 : vector<8x128xf32>
    %401 = arith.negf %188 : vector<8x128xf32>
    %402 = math.exp %401 : vector<8x128xf32>
    %cst_67 = arith.constant 1.000000e+00 : f32
    %403 = vector.broadcast %cst_67 : f32 to vector<8x128xf32>
    %404 = arith.addf %403, %402 : vector<8x128xf32>
    %405 = arith.divf %403, %404 : vector<8x128xf32>
    %406 = arith.mulf %188, %405 : vector<8x128xf32>
    %407 = arith.mulf %400, %406 : vector<8x128xf32>
    %cst_68 = arith.constant 2.000000e-01 : f32
    %408 = vector.broadcast %cst_68 : f32 to vector<8x128xf32>
    %409 = arith.divf %407, %408 : vector<8x128xf32>
    %410 = math.roundeven %409 : vector<8x128xf32>
    %cst_69 = arith.constant -1.280000e+02 : f32
    %cst_70 = arith.constant 1.270000e+02 : f32
    %411 = vector.broadcast %cst_69 : f32 to vector<8x128xf32>
    %412 = arith.maximumf %411, %410 : vector<8x128xf32>
    %413 = vector.broadcast %cst_70 : f32 to vector<8x128xf32>
    %414 = arith.minimumf %413, %412 : vector<8x128xf32>
    %c0_71 = arith.constant 0 : index
    %c0_72 = arith.constant 0 : index
    %415 = vector.load %arg4[%c0_71, %c0_72] : memref<128x64xi8, #tpu.memory_space<vmem>>, vector<128x64xi8>
    %416 = arith.sitofp %415 : vector<128x64xi8> to vector<128x64xf32>
    %417 = arith.truncf %416 : vector<128x64xf32> to vector<128x64xbf16>
    %418 = arith.truncf %414 : vector<8x128xf32> to vector<8x128xbf16>
    %cst_73 = arith.constant dense<0.000000e+00> : vector<8x64xf32>
    %419 = tpu.matmul %418, %417, %cst_73 {dimension_numbers = #tpu.dot_dimension_numbers<[1], [0], [0], [1], [0, 0, 1, 1], [], []>} : vector<8x128xbf16>, vector<128x64xbf16>, vector<8x64xf32> -> vector<8x64xf32>
    %cst_74 = arith.constant 2.000000e-03 : f32
    %420 = vector.broadcast %cst_74 : f32 to vector<8x64xf32>
    %421 = arith.mulf %419, %420 : vector<8x64xf32>
    %422 = arith.truncf %421 : vector<8x64xf32> to vector<8x64xbf16>
    %c0_75 = arith.constant 0 : index
    %c0_76 = arith.constant 0 : index
    %423 = vector.load %arg6[%c0_75, %c0_76] : memref<8x64xbf16, #tpu.memory_space<vmem>>, vector<8x64xbf16>
    tpu.vector_store %arg6[%c0_75, %c0_76], %422 {strides = array<i32>} : memref<8x64xbf16, #tpu.memory_space<vmem>>, vector<8x64xbf16>,
    return
  }
}

</mosaic_0001>

<bundles_post_ra>
// kernel: qjamba_mamba_mixer_forward.1
= control target key start
LH: loop header
LB: loop body
LE: loop exit
PB: predicated region body
PF: predicated region fallthrough
CT: control target
= control target key end

     0   :  { %v1306_v0 = vmov 0.0   ;;  %vm1307_vm0 = vmmov 0   ;;  %vm45_vm1 = vcmask 261120   ;;  %v109_v31 = vlaneseq  ;;  %s1309_s9 = smov 112   ;;  %s1310_s10 = smov 120   ;;  %s1687_s1 = inlined_call_operand.vmem [shape: s8[32,128], index: 1, kind: input, shape index: {}]   ;;  %s1688_s0 = inlined_call_operand.vmem [shape: f32[16,32], index: 0, kind: input, shape index: {}]   ;;  %s1689_s2 = inlined_call_operand.vmem [shape: s8[64,24], index: 2, kind: input, shape index: {}]   ;;  %s1690_s5 = inlined_call_operand.vmem [shape: f32[16,128], index: 5, kind: input, shape index: {}]   ;;  %s1691_s3 = inlined_call_operand.vmem [shape: s8[8,64], index: 3, kind: input, shape index: {}]   ;;  %s1692_s4 = inlined_call_operand.vmem [shape: s8[128,64], index: 4, kind: input, shape index: {}]   ;;  %s1693_s6 = inlined_call_operand.vmem [shape: bf16[8,64], index: 6, kind: output, shape index: {}]  }
   0x1   :  { %1122 = vmatprep.subr.bf16.mxu0 %v1306_v0  ;;  %v41_v1 = vld [vmem:[%s1687_s1] sm:$0xff]  ;;  %1126 = vmatprep.mubr.msk.bf16.mxu0 %vm1307_vm0, %v1306_v0  ;;  %v31_v3 = vld [vmem:[%s1688_s0 + $0x8] sm:$0xff]  ;;  %vm102_vm2 = vcmask 523264   ;;  %vm221_vm6 = vcmask 64512   ;;  %vm320_vm7 = vcmask 1043456   ;;  %vm422_vm9 = vcmask 130048  }
   0x2   :  { %v30_v2 = vld [vmem:[%s1688_s0] sm:$0xff]  ;;  %v42_v4 = vunpack.c.l.s8.bf16 %v41_v1  ;;  %v34_v6 = vmul.f32 25.0, %v31_v3  ;;  %1155 = vmatprep.subr.bf16.mxu1 %v1306_v0  ;;  %1171 = vmatprep.mubr.msk.bf16.mxu1 %vm1307_vm0, %v1306_v0  ;;  %v43_v7 = vunpack.c.h.s8.bf16 %v41_v1  ;;  %s1308_s0 = smov 64   ;;  %v167_v26 = vld [vmem:[%s1689_s2 + $0x8] sm:$0xff]  ;;  %v1401_v33 = vshrl.u32 %v109_v31, 7  ;;  %vm1176_vm10 = vmpackc.low %vm422_vm9, %vm422_vm9 }
   0x3   :  { %v33_v5 = vmul.f32 25.0, %v30_v2  ;;  %v166_v23 = vld [vmem:[%s1689_s2] sm:$0xff]  ;;  %v170_v27 = vunpack.c.l.s8.bf16 %v167_v26  ;;  %v171_v28 = vunpack.c.h.s8.bf16 %v167_v26  ;;  %v25_v38 = vld [vmem:[%s1690_s5 + $0x8] sm:$0xf]  ;;  %v1085_v59 = vld [vmem:[%s1690_s5 + $0xc] ss:$0 sm:$0xff] }
   0x4   :  { %1123 = vmatpush3.bf16.msra.mxu0 %v42_v4  ;;  %v1182_v9 = vround.rtne.f32 %v34_v6  ;;  %v168_v24 = vunpack.c.l.s8.bf16 %v166_v23  ;;  %v169_v25 = vunpack.c.h.s8.bf16 %v166_v23  ;;  %v1404_v34 = vsub.s32 0, %v1401_v33 }
   0x5   :  { %v1181_v8 = vround.rtne.f32 %v33_v5  ;;  %1124 = vmatprep.subr.bf16.mxu0 %v1306_v0  ;;  %v125_v35 = vsub.s32 1, %v1401_v33  ;;  %v134_v37 = vsub.s32 2, %v1401_v33  ;;  %vm111_vm3 = vcmp.ge.s32.totalorder %v1401_v33, 3 }
   0x6   :  { %v38_v11 = vmax.f32 %v1182_v9, -128.0  ;;  %vm120_vm4 = vcmp.ge.s32.totalorder %v1401_v33, 2  ;;  %vm129_vm5 = vcmp.ge.s32.totalorder %v1401_v33, 1  ;;  %v117_v40 = vrot.slane %v25_v38, %v1404_v34 }
   0x7   :  { %v37_v10 = vmax.f32 %v1181_v8, -128.0  ;;  %v126_v41 = vrot.slane %v25_v38, %v125_v35  ;;  %v140_v42 = vsub.s32 3, %v1401_v33  ;;  %v135_v47 = vrot.slane %v25_v38, %v134_v37 }
   0x8   :  { %1125 = vmatpush3.bf16.msra.mxu0 %v43_v7  ;;  %v40_v13 = vmin.f32 %v38_v11, 127.0  ;;  %vm1014_vm13 = vcmask 1041409   ;;  %vm1017_vm14 = vcmask 1042434   ;;  %vm1020_vm15 = vcmask 1043459  }
   0x9   :  { %v39_v12 = vmin.f32 %v37_v10, 127.0  ;;  %1130 = vmatprep.subr.bf16.mxu0 %v1306_v0  ;;  %v141_v51 = vrot.slane %v25_v38, %v140_v42 }
   0xb   :  { %v44_v14 = vpack.c.bf16 %v40_v13, %v39_v12 }
   0xd   :  { %1127 = vmatmul.mubr.msk.bf16.vlgmr.msra.gmra.mrb[0].mxu0 %vm45_vm1, %v44_v14  ;;  %vm1026_vm1 = vcmask 1045509  }
   0xe   :  { %1138 = vmatprep.mubr.msk.bf16.mxu0 %vm1307_vm0, %v1306_v0  ;;  %1131 = vmatpush3.bf16.msra.mxu0 %v168_v24 }
   0xf   :  { %1132 = vmatprep.subr.bf16.mxu0 %v1306_v0 }
  0x12   :  { %1133 = vmatpush3.bf16.msra.mxu0 %v169_v25 }
  0x13   :  { %1134 = vmatprep.subr.bf16.mxu0 %v1306_v0 }
  0x16   :  { %1135 = vmatpush3.bf16.msra.mxu0 %v170_v27 }
  0x17   :  { %1136 = vmatprep.subr.bf16.mxu0 %v1306_v0 }
  0x1a   :  { %1137 = vmatpush3.bf16.msra.mxu0 %v171_v28 }
  0x1b   :  { %1142 = vmatprep.subr.bf16.mxu0 %v1306_v0 }
  0xe0   :  { %v83_v15 = vpop.f32.mrb[0].mxu0 }
  0xe1   :  { %v1128_v16 = vpop.f32.mrb[1].mxu0  ;;  %v90_v29 = vmul.f32 0.004, %v83_v15 }
  0xe2   :  { %v86_v17 = vpop.f32.mrb[2].mxu0 }
  0xe3   :  { %v91_v18 = vmul.f32 0.004, %v86_v17  ;;  %v1129_v19 = vpop.f32.mrb[3].mxu0  ;;  %v1183_v30 = vround.rtne.f32 %v90_v29 }
  0xe5   :  { %v1184_v20 = vround.rtne.f32 %v91_v18  ;;  %v1398_v32 = vmax.f32 %v1183_v30, -128.0  ;;  %v314_v30 = vld [vmem:[%s1691_s3] sm:$0x3] }
  0xe6   :  { %v315_v38 = vunpack.c.l.s8.bf16 %v314_v30 }
  0xe7   :  { %v1382_v21 = vmax.f32 %v1184_v20, -128.0  ;;  %v96_v36 = vmin.f32 %v1398_v32, 127.0 }
  0xe9   :  { %v97_v22 = vmin.f32 %v1382_v21, 127.0 }
  0xeb   :  { %99 = vrot.lane.b32.xlu0 %v97_v22, %s1308_s0 }
 0x15d   :  { %v100_v39 = vpop.permute.xlu0 %99 }
 0x15e   :  { %v103_v43 = vsel %vm102_vm2, %v96_v36, %v100_v39  ;;  %v322_v39 = vsel %vm320_vm7, %v315_v38, 0 }
 0x15f   :  { %v112_v44 = vrot.slane %v103_v43, 5  ;;  %v121_v45 = vrot.slane %v103_v43, 6  ;;  %v130_v46 = vrot.slane %v103_v43, 7  ;;  %v142_v57 = vmul.f32 %v141_v51, %v103_v43 }
 0x161   :  { %v113_v48 = vsel %vm111_vm3, %v112_v44, 0.0  ;;  %v122_v49 = vsel %vm120_vm4, %v121_v45, 0.0  ;;  %v131_v50 = vsel %vm129_vm5, %v130_v46, 0.0  ;;  %vm1032_vm3 = vcmask 1047559  }
 0x162   :  { %v118_v52 = vmul.f32 %v117_v40, %v113_v48  ;;  %v127_v53 = vmul.f32 %v126_v41, %v122_v49  ;;  %v136_v55 = vmul.f32 %v135_v47, %v131_v50  ;;  %vm1078_vm4 = vcmask 519168  }
 0x164   :  { %v128_v54 = vadd.f32 %v127_v53, %v118_v52 }
 0x166   :  { %v137_v56 = vadd.f32 %v136_v55, %v128_v54 }
 0x168   :  { %v143_v58 = vadd.f32 %v142_v57, %v137_v56 }
 0x16a   :  { %v144_v60 = vmul.f32 0.1, %v143_v58 }
 0x16c   :  { %v149_v61 = vadd.f32 %v1085_v59, %v144_v60  ;;  %v1088_v59 = vld [vmem:[%s1690_s5 + $0xf] ss:$0 sm:$0xff] }
 0x16e   :  { %v1086_v62 = vmul.f32 -1.442695, %v149_v61 }
 0x170   :  { %1266 = vpow2.f32 %v1086_v62 }
 0x17a   :  { %v1267_v63 = vpop.eup %1266 }
 0x17b   :  { %v153_v1 = vadd.f32 1.0, %v1267_v63 }
 0x17d   :  { %1268 = vrcp.f32 %v153_v1 }
 0x187   :  { %v1269_v2 = vpop.eup %1268 }
 0x188   :  { %v156_v3 = vmul.f32 %v1269_v2, %v149_v61 }
 0x18a   :  { %v158_v4 = vmul.f32 33.333336, %v156_v3 }
 0x18c   :  { %v1185_v5 = vround.rtne.f32 %v158_v4 }
 0x18e   :  { %v160_v6 = vmax.f32 %v1185_v5, -128.0 }
 0x190   :  { %v1429_v7 = vmin.f32 %v160_v6, 127.0 }
 0x192   :  { %163 = vrot.lane.b32.xlu0 %v1429_v7, %s1308_s0 }
 0x204   :  { %v164_v8 = vpop.permute.xlu0 %163 }
 0x205   :  { %v172_v9 = vpack.c.bf16 %v164_v8, %v1429_v7 }
 0x207   :  { %1139 = vmatmul.mubr.msk.bf16.vlgmr.msra.gmra.mrb[4].mxu0 %vm102_vm2, %v172_v9 }
 0x208   :  { %1144 = vmatprep.mubr.msk.bf16.mxu0 %vm1307_vm0, %v1306_v0  ;;  %1143 = vmatpush3.bf16.msra.mxu0 %v322_v39  ;;  %vm1023_vm0 = vcmask 1044484  }
 0x2da   :  { %v210_v10 = vpop.f32.mrb[4].mxu0 }
 0x2db   :  { %v1437_v11 = vmul.f32 0.0003, %v210_v10  ;;  %v1140_v12 = vpop.f32.mrb[5].mxu0 }
 0x2dc   :  { %v213_v13 = vpop.f32.mrb[6].mxu0 }
 0x2dd   :  { %v1439_v14 = vmul.f32 0.0003, %v213_v13  ;;  %v1141_v15 = vpop.f32.mrb[7].mxu0  ;;  %v219_v16 = vmul.f32 %v1437_v11, %v1437_v11 }
 0x2df   :  { %284 = vrot.lane.b32.xlu0 %v219_v16, %s1309_s9  ;;  %254 = vrot.lane.b32.xlu1 %v219_v16, %s1310_s10  ;;  %v220_v17 = vmul.f32 %v1439_v14, %v1439_v14  ;;  %v222_v27 = vsel %vm221_vm6, %v219_v16, 0.0 }
 0x2e1   :  { %v225_v29 = vsel %vm221_vm6, %v220_v17, 0.0 }
 0x2e3   :  { %256 = vrot.lane.b32.xlu1 %v220_v17, %s1310_s10 }
 0x2e7   :  { %286 = vrot.lane.b32.xlu1 %v220_v17, %s1309_s9 }
 0x351   :  { %v255_v18 = vpop.permute.xlu1 %254  ;;  %v285_v20 = vpop.permute.xlu0 %284 }
 0x352   :  { %v260_v19 = vsel %vm221_vm6, %v255_v18, 0.0  ;;  %v290_v24 = vsel %vm221_vm6, %v285_v20, 0.0 }
 0x353   :  { %261 = vadd.xlane.f32.xlu0 %v260_v19 }
 0x355   :  { %v257_v23 = vpop.permute.xlu1 %256 }
 0x356   :  { %v263_v25 = vsel %vm221_vm6, %v257_v23, 0.0 }
 0x357   :  { %291 = vadd.xlane.f32.xlu0 %v290_v24  ;;  %264 = vadd.xlane.f32.xlu1 %v263_v25 }
 0x359   :  { %v287_v26 = vpop.permute.xlu1 %286 }
 0x35a   :  { %v293_v28 = vsel %vm221_vm6, %v287_v26, 0.0 }
 0x35b   :  { %223 = vadd.xlane.f32.xlu1 %v222_v27  ;;  %294 = vadd.xlane.f32.xlu0 %v293_v28 }
 0x35f   :  { %226 = vadd.xlane.f32.xlu0 %v225_v29 }
 0x3e0   :  { %v262_v40 = vpop.xlane.xlu0 %261 }
 0x3e1   :  { %v266_v41 = vmul.f32 0.125, %v262_v40 }
 0x3e3   :  { %v268_v43 = vadd.f32 1e-06, %v266_v41 }
 0x3e4   :  { %v292_v44 = vpop.xlane.xlu0 %291  ;;  %v265_v45 = vpop.xlane.xlu1 %264 }
 0x3e5   :  { %1270 = vrsqrt.f32 %v268_v43  ;;  %v296_v46 = vmul.f32 0.125, %v292_v44  ;;  %v267_v47 = vmul.f32 0.125, %v265_v45 }
 0x3e7   :  { %v298_v48 = vadd.f32 1e-06, %v296_v46  ;;  %v269_v49 = vadd.f32 1e-06, %v267_v47 }
 0x3e8   :  { %v295_v50 = vpop.xlane.xlu0 %294  ;;  %v224_v51 = vpop.xlane.xlu1 %223 }
 0x3e9   :  { %1272 = vrsqrt.f32 %v298_v48  ;;  %v297_v52 = vmul.f32 0.125, %v295_v50  ;;  %v229_v53 = vmul.f32 0.125, %v224_v51 }
 0x3ea   :  { %1274 = vrsqrt.f32 %v269_v49  ;;  %v415_v49 = vand.u32 127, %v109_v31 }
 0x3eb   :  { %v299_v54 = vadd.f32 1e-06, %v297_v52  ;;  %v231_v55 = vadd.f32 1e-06, %v229_v53 }
 0x3ec   :  { %v227_v56 = vpop.xlane.xlu0 %226  ;;  %vm416_vm8 = vcmp.eq.s32.totalorder %v1401_v33, %v415_v49 }
 0x3ed   :  { %1276 = vrsqrt.f32 %v299_v54  ;;  %v230_v57 = vmul.f32 0.125, %v227_v56  ;;  %v1091_v54 = vsel %vm416_vm8, 1.0, %v1306_v0 }
 0x3ee   :  { %1278 = vrsqrt.f32 %v231_v55 }
 0x3ef   :  { %v1271_v58 = vpop.eup %1270  ;;  %v232_v60 = vadd.f32 1e-06, %v230_v57 }
 0x3f0   :  { %v272_v61 = vmul.f32 %v1271_v58, %v1437_v11 }
 0x3f1   :  { %1280 = vrsqrt.f32 %v232_v60 }
 0x3f2   :  { %v274_v62 = vmul.f32 %v1088_v59, %v272_v61 }
 0x3f3   :  { %v1273_v63 = vpop.eup %1272 }
 0x3f4   :  { %v1275_v1 = vpop.eup %1274  ;;  %v276_v2 = vmul.f32 50.0, %v274_v62  ;;  %v302_v3 = vmul.f32 %v1273_v63, %v1437_v11  ;;  %v1311_v63 = vmov 9  }
 0x3f5   :  { %v273_v4 = vmul.f32 %v1275_v1, %v1439_v14  ;;  %1235 = vset.pattern.permute.xlu1 %v1311_v63  ;;  %v1312_v1 = vmov 1  }
 0x3f6   :  { %v304_v5 = vmul.f32 %v1088_v59, %v302_v3  ;;  %v1188_v9 = vround.rtne.f32 %v276_v2  ;;  %1234 = vset.pattern.permute.xlu0 %v1312_v1 }
 0x3f7   :  { %v1277_v6 = vpop.eup %1276  ;;  %v275_v8 = vmul.f32 %v1088_v59, %v273_v4 }
 0x3f8   :  { %v1279_v10 = vpop.eup %1278  ;;  %v303_v12 = vmul.f32 %v1277_v6, %v1439_v14  ;;  %v306_v13 = vmul.f32 50.0, %v304_v5  ;;  %v280_v24 = vmax.f32 %v1188_v9, -128.0 }
 0x3f9   :  { %v235_v15 = vmul.f32 %v1279_v10, %v1437_v11  ;;  %v277_v16 = vmul.f32 50.0, %v275_v8 }
 0x3fa   :  { %v305_v17 = vmul.f32 %v1088_v59, %v303_v12  ;;  %v1190_v18 = vround.rtne.f32 %v306_v13  ;;  %v282_v39 = vmin.f32 %v280_v24, 127.0 }
 0x3fb   :  { %v1281_v19 = vpop.eup %1280  ;;  %v241_v20 = vmul.f32 %v1088_v59, %v235_v15  ;;  %v1189_v23 = vround.rtne.f32 %v277_v16  ;;  %v1313_v16 = vmov 2  }
 0x3fc   :  { %v236_v25 = vmul.f32 %v1281_v19, %v1439_v14  ;;  %v307_v26 = vmul.f32 50.0, %v305_v17  ;;  %v310_v29 = vmax.f32 %v1190_v18, -128.0  ;;  %v1314_v17 = vmov 10  }
 0x3fd   :  { %v244_v27 = vmul.f32 50.0, %v241_v20  ;;  %v281_v28 = vmax.f32 %v1189_v23, -128.0  ;;  %v1315_v18 = vmov 8   ;;  %v1316_v19 = vmov 0  }
 0x3fe   :  { %v242_v30 = vmul.f32 %v1088_v59, %v236_v25  ;;  %v1191_v38 = vround.rtne.f32 %v307_v26  ;;  %v312_v45 = vmin.f32 %v310_v29, 127.0  ;;  %v1317_v20 = vmov 3  }
 0x3ff   :  { %v283_v40 = vmin.f32 %v281_v28, 127.0  ;;  %v1186_v41 = vround.rtne.f32 %v244_v27  ;;  %v1318_v23 = vmov 11   ;;  %v1319_v25 = vmov 4  }
 0x400   :  { %v245_v43 = vmul.f32 50.0, %v242_v30  ;;  %v311_v11 = vmax.f32 %v1191_v38, -128.0  ;;  %v1320_v26 = vmov 12   ;;  %v1321_v27 = vmov 13  }
 0x401   :  { %v1224_v44 = vpack.i.bf16 %v283_v40, %v282_v39  ;;  %v248_v48 = vmax.f32 %v1186_v41, -128.0  ;;  %v1322_v28 = vmov 5   ;;  %v1323_v29 = vmov 14  }
 0x402   :  { %v313_v46 = vmin.f32 %v311_v11, 127.0  ;;  %v1187_v47 = vround.rtne.f32 %v245_v43  ;;  %v1324_v30 = vmov 15  }
 0x403   :  { %1225 = vrot.lane.b32.xlu1 %v1224_v44, %s1310_s10  ;;  %v250_v51 = vmin.f32 %v248_v48, 127.0  ;;  %v1326_v48 = vmov 7  }
 0x404   :  { %v1229_v14 = vpack.i.bf16 %v313_v46, %v312_v45  ;;  %v249_v50 = vmax.f32 %v1187_v47, -128.0  ;;  %v1090_v45 = vld [vmem:[%s1690_s5 + $0xe] ss:$0 sm:$0xff]  ;;  %v1325_v46 = vmov 6  }
 0x406   :  { %1230 = vrot.lane.b32.xlu0 %v1229_v14, %s1310_s10  ;;  %v251_v52 = vmin.f32 %v249_v50, 127.0 }
 0x408   :  { %v316_v53 = vpack.c.bf16 %v251_v52, %v250_v51  ;;  %v977_v52 = vld [vmem:[%s1692_s4] sm:$0xff] }
 0x40a   :  { %105 = vrot.lane.b32.xlu0 %v96_v36, %s1308_s0  ;;  %1145 = vmatmul.mubr.msk.bf16.vlgmr.msra.gmra.mrb[8].mxu0 %vm221_vm6, %v316_v53  ;;  %v413_v36 = vadd.s32 8, %v1401_v33  ;;  %v981_v53 = vunpack.c.l.s8.bf16 %v977_v52 }
 0x40b   :  { %1152 = vmatprep.mubr.msk.f32.mxu0 %vm422_vm9, %v1091_v54  ;;  %v1327_v54 = vmov 1966171168  }
 0x40c   :  { %vm417_vm11 = vcmp.eq.s32.totalorder %v413_v36, %v415_v49  ;;  %1156 = vmatpush3.bf16.msra.mxu1 %v981_v53 }
 0x40d   :  { %v1092_v62 = vsel %vm417_vm11, 1.0, %v1306_v0  ;;  %1157 = vmatprep.subr.bf16.mxu1 %v1306_v0 }
 0x475   :  { %v1226_v31 = vpop.permute.xlu1 %1225 }
 0x476   :  { %v1228_v56 = vunpack.i.h.bf16 %v1226_v31  ;;  %v1227_v57 = vunpack.i.l.bf16 %v1226_v31  ;;  %v515_v31 = vunpack.c.l.s4 %v1327_v54 }
 0x478   :  { %v1231_v55 = vpop.permute.xlu0 %1230 }
 0x479   :  { %v1233_v58 = vunpack.i.h.bf16 %v1231_v55  ;;  %v1232_v59 = vunpack.i.l.bf16 %v1231_v55 }
 0x47b   :  { %v412_v60 = vsel %vm221_vm6, %v1228_v56, %v1233_v58  ;;  %v411_v61 = vsel %vm221_vm6, %v1227_v57, %v1232_v59  ;;  %v982_v56 = vunpack.c.h.s8.bf16 %v977_v52  ;;  %v516_v57 = vunpack.c.0.s8 %v515_v31  ;;  %v978_v59 = vld [vmem:[%s1692_s4 + $0x8] sm:$0xff] }
 0x47c   :  { %v1175_v32 = vpack.c.bf16 %v412_v60, %v411_v61  ;;  %v983_v60 = vunpack.c.l.s8.bf16 %v978_v59 }
 0x47d   :  { %1158 = vmatpush3.bf16.msra.mxu1 %v982_v56  ;;  %v1535_v61 = vsub.s32 %v516_v57, %v1401_v33 }
 0x47e   :  { %1177 = vmatprep.subr.msk.bf16.mxu0 %vm1176_vm10, %v1175_v32  ;;  %1159 = vmatprep.subr.bf16.mxu1 %v1306_v0 }
 0x47f   :  { %1180 = vmatpush3.bf16.xpose.msk.msra.mxu0 %vm1176_vm10, %v1175_v32  ;;  %v984_v32 = vunpack.c.h.s8.bf16 %v978_v59 }
 0x481   :  { %1160 = vmatpush3.bf16.msra.mxu1 %v983_v60 }
 0x482   :  { %1161 = vmatprep.subr.bf16.mxu1 %v1306_v0 }
 0x485   :  { %1162 = vmatpush3.bf16.msra.mxu1 %v984_v32 }
 0x486   :  { %1153 = vmatmul.mubr.msk.f32.vlgmr.msra.gmra.mrb[12].mxu0 %vm422_vm9, %v1092_v62  ;;  %v979_v62 = vld [vmem:[%s1692_s4 + $0x10] sm:$0xff]  ;;  %1163 = vmatprep.subr.bf16.mxu1 %v1306_v0 }
 0x4dd   :  { %v1482_v2 = vpop.f32.mrb[8].mxu0 }
 0x4de   :  { %v1146_v3 = vpop.f32.mrb[9].mxu0  ;;  %v365_v38 = vmul.f32 0.006666667, %v1482_v2 }
 0x4df   :  { %v361_v4 = vpop.f32.mrb[10].mxu0  ;;  %v106_v3 = vpop.permute.xlu0 %105 }
 0x4e0   :  { %v366_v5 = vmul.f32 0.006666667, %v361_v4  ;;  %v1147_v6 = vpop.f32.mrb[11].mxu0  ;;  %v1192_v39 = vround.rtne.f32 %v365_v38 }
 0x4e1   :  { %v980_v6 = vld [vmem:[%s1692_s4 + $0x18] sm:$0xff] }
 0x4e2   :  { %v1193_v8 = vround.rtne.f32 %v366_v5  ;;  %v369_v40 = vmax.f32 %v1192_v39, -128.0  ;;  %v986_v5 = vunpack.c.h.s8.bf16 %v979_v62 }
 0x4e4   :  { %v370_v9 = vmax.f32 %v1193_v8, -128.0  ;;  %v371_v43 = vmin.f32 %v369_v40, 127.0 }
 0x4e6   :  { %v372_v10 = vmin.f32 %v370_v9, 127.0 }
 0x4e8   :  { %374 = vrot.lane.b32.xlu1 %v372_v10, %s1308_s0 }
 0x559   :  { %v1154_v12 = vpop.f32.mrb[12].mxu0 }
 0x55a   :  { %v1485_v13 = vmul.f32 0.02, %v1154_v12  ;;  %v501_v15 = vpop.f32.mrb[13].mxu0  ;;  %v375_v41 = vpop.permute.xlu1 %374  ;;  %v987_v12 = vunpack.c.l.s8.bf16 %v980_v6 }
 0x55b   :  { %v1495_v24 = vmul.f32 0.02, %v501_v15  ;;  %v377_v11 = vsel %vm102_vm2, %v371_v43, %v375_v41  ;;  %v1564_v15 = vsel %vm102_vm2, %v106_v3, %v97_v22 }
 0x55c   :  { %754 = vperm.xlu1 %1235, %v1485_v13   ;;  %750 = vperm.xlu0 %1234, %v1485_v13   ;;  %v378_v44 = vmul.f32 0.03, %v377_v11 }
 0x55e   :  { %v383_v47 = vadd.f32 %v1090_v45, %v378_v44 }
 0x560   :  { %1236 = vset.pattern.permute.xlu1 %v1313_v16  ;;  %1237 = vset.pattern.permute.xlu0 %v1314_v17  ;;  %v385_v49 = vmin.f32 %v383_v47, 20.0  ;;  %vm384_vm12 = vcmp.gt.f32.partialorder %v383_v47, 20.0 }
 0x561   :  { %759 = vperm.xlu1 %1236, %v1485_v13   ;;  %763 = vperm.xlu0 %1237, %v1485_v13  }
 0x562   :  { %v386_v14 = vmul.f32 1.442695, %v385_v49 }
 0x564   :  { %1282 = vpow2.f32 %v386_v14 }
 0x565   :  { %1239 = vset.pattern.permute.xlu1 %v1315_v18  ;;  %1238 = vset.pattern.permute.xlu0 %v1316_v19 }
 0x566   :  { %745 = vperm.xlu1 %1239, %v1485_v13   ;;  %741 = vperm.xlu0 %1238, %v1485_v13  }
 0x56a   :  { %1240 = vset.pattern.permute.xlu1 %v1317_v20  ;;  %1241 = vset.pattern.permute.xlu0 %v1318_v23 }
 0x56b   :  { %768 = vperm.xlu1 %1240, %v1485_v13   ;;  %772 = vperm.xlu0 %1241, %v1485_v13  }
 0x56e   :  { %v1283_v50 = vpop.eup %1282 }
 0x56f   :  { %1242 = vset.pattern.permute.xlu1 %v1319_v25  ;;  %1245 = vset.pattern.permute.xlu0 %v1315_v18  ;;  %v388_v51 = vadd.f32 1.0, %v1283_v50  ;;  %v988_v18 = vunpack.c.h.s8.bf16 %v980_v6 }
 0x570   :  { %777 = vperm.xlu1 %1242, %v1485_v13   ;;  %632 = vperm.xlu0 %1245, %v1495_v24  }
 0x571   :  { %1284 = vlog2.f32 %v388_v51 }
 0x574   :  { %1243 = vset.pattern.permute.xlu1 %v1320_v26  ;;  %1248 = vset.pattern.permute.xlu0 %v1313_v16 }
 0x575   :  { %781 = vperm.xlu1 %1243, %v1485_v13   ;;  %656 = vperm.xlu0 %1248, %v1495_v24  }
 0x579   :  { %1244 = vset.pattern.permute.xlu1 %v1316_v19  ;;  %1251 = vset.pattern.permute.xlu0 %v1318_v23  ;;  %v1098_v19 = vmul.f32 -0.1, %v1564_v15 }
 0x57a   :  { %674 = vperm.xlu0 %1251, %v1495_v24   ;;  %628 = vperm.xlu1 %1244, %v1495_v24  }
 0x57b   :  { %v1285_v55 = vpop.eup %1284  ;;  %v914_v21 = vmul.f32 1.442695, %v1098_v19 }
 0x57c   :  { %v390_v58 = vmul.f32 0.6931472, %v1285_v55 }
 0x57e   :  { %1255 = vset.pattern.permute.xlu0 %v1321_v27  ;;  %1246 = vset.pattern.permute.xlu1 %v1312_v1  ;;  %v391_v36 = vsel %vm384_vm12, %v383_v47, %v390_v58  ;;  %v985_v1 = vunpack.c.l.s8.bf16 %v979_v62 }
 0x57f   :  { %702 = vperm.xlu0 %1255, %v1495_v24   ;;  %642 = vperm.xlu1 %1246, %v1495_v24   ;;  %v513_v11 = vcombine.high %v391_v36, %v391_v36 }
 0x580   :  { %1164 = vmatpush3.bf16.msra.mxu1 %v985_v1 }
 0x581   :  { %1165 = vmatprep.subr.bf16.mxu1 %v1306_v0  ;;  %v527_v50 = vrot.slane %v513_v11, %v1535_v61 }
 0x583   :  { %1256 = vset.pattern.permute.xlu0 %v1322_v28  ;;  %1247 = vset.pattern.permute.xlu1 %v1311_v63  ;;  %v520_v63 = vrot.slane %v391_v36, %v1535_v61  ;;  %v1594_v57 = vrot.slane %v527_v50, %v1535_v61  ;;  %v529_v32 = vcombine.high %v527_v50, %v527_v50 }
 0x584   :  { %786 = vperm.xlu0 %1256, %v1485_v13   ;;  %646 = vperm.xlu1 %1247, %v1495_v24  }
 0x585   :  { %v536_v4 = vrot.slane %v520_v63, %v1535_v61  ;;  %1166 = vmatpush3.bf16.msra.mxu1 %v986_v5  ;;  %v1600_v3 = vrot.slane %v529_v32, %v1535_v61 }
 0x586   :  { %1167 = vmatprep.subr.bf16.mxu1 %v1306_v0 }
 0x587   :  { %v565_v10 = vrot.slane %v536_v4, %v1404_v34 }
 0x588   :  { %1259 = vset.pattern.permute.xlu0 %v1323_v29  ;;  %1249 = vset.pattern.permute.xlu1 %v1314_v17 }
 0x589   :  { %799 = vperm.xlu0 %1259, %v1485_v13   ;;  %660 = vperm.xlu1 %1249, %v1495_v24  }
 0x58a   :  { %1168 = vmatpush3.bf16.msra.mxu1 %v987_v12 }
 0x58b   :  { %1169 = vmatprep.subr.bf16.mxu1 %v1306_v0 }
 0x58d   :  { %1265 = vset.pattern.permute.xlu0 %v1324_v30  ;;  %1250 = vset.pattern.permute.xlu1 %v1317_v20  ;;  %v528_v20 = vcombine.high %v520_v63, %v520_v63  ;;  %v581_v63 = vrot.slane %v1594_v57, %v1404_v34 }
 0x58e   :  { %670 = vperm.xlu1 %1250, %v1495_v24   ;;  %1170 = vmatpush3.bf16.msra.mxu1 %v988_v18 }
 0x58f   :  { %v550_v22 = vrot.slane %v528_v20, %v1535_v61  ;;  %v1097_v61 = vld [vmem:[%s1690_s5 + $0xd] ss:$0 sm:$0xff]  ;;  %v585_v20 = vrot.slane %v1600_v3, %v1404_v34 }
 0x591   :  { %v560_v40 = vcombine.high %v550_v22, %v550_v22 }
 0x592   :  { %1252 = vset.pattern.permute.xlu1 %v1319_v25 }
 0x593   :  { %684 = vperm.xlu1 %1252, %v1495_v24   ;;  %v577_v47 = vrot.slane %v560_v40, %v1404_v34 }
 0x597   :  { %1253 = vset.pattern.permute.xlu1 %v1320_v26 }
 0x598   :  { %688 = vperm.xlu1 %1253, %v1495_v24  }
 0x59c   :  { %1254 = vset.pattern.permute.xlu1 %v1322_v28  ;;  %v569_v28 = vrot.slane %v550_v22, %v1404_v34 }
 0x59d   :  { %698 = vperm.xlu1 %1254, %v1495_v24  }
 0x5a1   :  { %1257 = vset.pattern.permute.xlu1 %v1321_v27  ;;  %v558_v27 = vcombine.high %v536_v4, %v536_v4 }
 0x5a2   :  { %790 = vperm.xlu1 %1257, %v1485_v13  }
 0x5a3   :  { %v573_v38 = vrot.slane %v558_v27, %v1404_v34 }
 0x5a6   :  { %1258 = vset.pattern.permute.xlu1 %v1325_v46 }
 0x5a7   :  { %795 = vperm.xlu1 %1258, %v1485_v13  }
 0x5ab   :  { %1260 = vset.pattern.permute.xlu1 %v1326_v48 }
 0x5ac   :  { %804 = vperm.xlu1 %1260, %v1485_v13  }
 0x5b0   :  { %1261 = vset.pattern.permute.xlu1 %v1325_v46 }
 0x5b1   :  { %712 = vperm.xlu1 %1261, %v1495_v24  }
 0x5b5   :  { %1262 = vset.pattern.permute.xlu1 %v1323_v29 }
 0x5b6   :  { %716 = vperm.xlu1 %1262, %v1495_v24  }
 0x5ba   :  { %1263 = vset.pattern.permute.xlu1 %v1326_v48 }
 0x5bb   :  { %726 = vperm.xlu1 %1263, %v1495_v24  }
 0x5bf   :  { %1264 = vset.pattern.permute.xlu1 %v1324_v30  ;;  %v392_v30 = vmul.f32 0.03, %v1429_v7 }
 0x5c0   :  { %730 = vperm.xlu1 %1264, %v1495_v24  }
 0x5c1   :  { %v1584_v43 = vmul.f32 %v392_v30, %v391_v36 }
 0x5c3   :  { %v639_v49 = vrot.slane %v1584_v43, %v1404_v34  ;;  %v653_v4 = vrot.slane %v1584_v43, %v125_v35  ;;  %v667_v27 = vrot.slane %v1584_v43, %v134_v37 }
 0x5c4   :  { %808 = vperm.xlu1 %1264, %v1485_v13   ;;  %v1558_v13 = vld [vmem:[%s1690_s5] sm:$0xff] }
 0x5c5   :  { %v602_v17 = vmul.f32 %v565_v10, %v1558_v13  ;;  %v603_v39 = vmul.f32 %v569_v28, %v1558_v13  ;;  %v604_v45 = vmul.f32 %v573_v38, %v1558_v13  ;;  %v605_v55 = vmul.f32 %v577_v47, %v1558_v13 }
 0x5c6   :  { %v606_v18 = vmul.f32 %v581_v63, %v1558_v13 }
 0x5c7   :  { %v610_v25 = vmul.f32 1.442695, %v602_v17  ;;  %v612_v44 = vmul.f32 1.442695, %v603_v39  ;;  %v614_v54 = vmul.f32 1.442695, %v604_v45  ;;  %v1619_v45 = vmul.f32 %v1097_v61, %v392_v30 }
 0x5c8   :  { %v616_v36 = vmul.f32 1.442695, %v605_v55 }
 0x5c9   :  { %1286 = vpow2.f32 %v610_v25 }
 0x5ca   :  { %1288 = vpow2.f32 %v914_v21 }
 0x5cb   :  { %1290 = vpow2.f32 %v612_v44  ;;  %v618_v44 = vmul.f32 1.442695, %v606_v18 }
 0x5cc   :  { %1292 = vpow2.f32 %v614_v54 }
 0x5d3   :  { %v1287_v46 = vpop.eup %1286 }
 0x5d4   :  { %v1289_v48 = vpop.eup %1288  ;;  %v812_v52 = vmul.f32 0.0, %v1287_v46  ;;  %v393_v46 = vmul.f32 0.1, %v1564_v15  ;;  %v681_v15 = vrot.slane %v1584_v43, %v140_v42 }
 0x5d5   :  { %v916_v31 = vadd.f32 1.0, %v1289_v48  ;;  %v1291_v6 = vpop.eup %1290 }
 0x5d6   :  { %v1293_v21 = vpop.eup %1292 }
 0x5d7   :  { %1294 = vrcp.f32 %v916_v31 }
 0x5d8   :  { %1296 = vpow2.f32 %v616_v36 }
 0x5d9   :  { %1298 = vpow2.f32 %v618_v44 }
 0x5db   :  { %v1542_v2 = vpop.permute.xlu1 %754  ;;  %v1552_v9 = vpop.permute.xlu0 %750 }
 0x5dc   :  { %v757_v22 = vsel %vm102_vm2, %v1552_v9, %v1542_v2  ;;  %v607_v2 = vmul.f32 %v585_v20, %v1558_v13 }
 0x5e0   :  { %v1550_v8 = vpop.permute.xlu1 %759  ;;  %v1568_v23 = vpop.permute.xlu0 %763 }
 0x5e1   :  { %v1295_v38 = vpop.eup %1294  ;;  %v766_v50 = vsel %vm102_vm2, %v1550_v8, %v1568_v23 }
 0x5e2   :  { %v1623_v9 = vmul.f32 %v1295_v38, %v393_v46 }
 0x5e4   :  { %v922_v46 = vrot.slane %v1623_v9, 2 }
 0x5e5   :  { %v746_v16 = vpop.permute.xlu1 %745  ;;  %v742_v26 = vpop.permute.xlu0 %741 }
 0x5e6   :  { %v748_v58 = vsel %vm102_vm2, %v742_v26, %v746_v16 }
 0x5ea   :  { %v1571_v24 = vpop.permute.xlu1 %768  ;;  %v1579_v0 = vpop.permute.xlu0 %772 }
 0x5eb   :  { %v775_v23 = vsel %vm102_vm2, %v1571_v24, %v1579_v0 }
 0x5ef   :  { %v1575_v29 = vpop.permute.xlu1 %777  ;;  %v633_v7 = vpop.permute.xlu0 %632 }
 0x5f4   :  { %v1582_v41 = vpop.permute.xlu1 %781  ;;  %v657_v25 = vpop.permute.xlu0 %656 }
 0x5f9   :  { %v629_v14 = vpop.permute.xlu1 %628 }
 0x5fa   :  { %v635_v51 = vsel %vm102_vm2, %v629_v14, %v633_v7  ;;  %v1297_v14 = vpop.eup %1296 }
 0x5fb   :  { %v640_v53 = vmul.f32 %v639_v49, %v635_v51  ;;  %v675_v51 = vpop.permute.xlu0 %674  ;;  %v1299_v18 = vpop.eup %1298 }
 0x5fd   :  { %v813_v56 = vadd.f32 %v812_v52, %v640_v53 }
 0x5fe   :  { %v643_v59 = vpop.permute.xlu1 %642 }
 0x5ff   :  { %v828_v60 = vmul.f32 %v813_v56, %v748_v58  ;;  %v814_v16 = vmul.f32 %v1291_v6, %v813_v56  ;;  %v890_v6 = vrot.slane %v1619_v45, 1 }
 0x601   :  { %v836_v62 = vrot.slane %v828_v60, 4 }
 0x603   :  { %v837_v1 = vadd.f32 %v836_v62, %v828_v60  ;;  %v647_v5 = vpop.permute.xlu1 %646 }
 0x604   :  { %v649_v12 = vsel %vm102_vm2, %v643_v59, %v647_v5  ;;  %v620_v59 = vmul.f32 1.442695, %v607_v2  ;;  %v784_v2 = vsel %vm102_vm2, %v1575_v29, %v1582_v41 }
 0x605   :  { %v838_v10 = vrot.slane %v837_v1, 2  ;;  %v654_v17 = vmul.f32 %v653_v4, %v649_v12  ;;  %v694_v4 = vsub.s32 4, %v1401_v33 }
 0x606   :  { %1300 = vpow2.f32 %v620_v59 }
 0x607   :  { %v839_v19 = vadd.f32 %v838_v10, %v837_v1  ;;  %v815_v35 = vadd.f32 %v814_v16, %v654_v17  ;;  %v695_v0 = vrot.slane %v1584_v43, %v694_v4 }
 0x608   :  { %v661_v28 = vpop.permute.xlu1 %660 }
 0x609   :  { %v840_v26 = vrot.slane %v839_v19, 1  ;;  %v829_v39 = vmul.f32 %v815_v35, %v757_v22  ;;  %v816_v40 = vmul.f32 %v1293_v21, %v815_v35  ;;  %v663_v11 = vsel %vm102_vm2, %v657_v25, %v661_v28 }
 0x60a   :  { %v668_v48 = vmul.f32 %v667_v27, %v663_v11  ;;  %v708_v21 = vsub.s32 5, %v1401_v33  ;;  %v703_v11 = vpop.permute.xlu0 %702 }
 0x60b   :  { %v841_v47 = vadd.f32 %v840_v26, %v839_v19  ;;  %v842_v7 = vrot.slane %v829_v39, 4  ;;  %v921_v19 = vrot.slane %v1623_v9, 1 }
 0x60c   :  { %v817_v49 = vadd.f32 %v816_v40, %v668_v48 }
 0x60d   :  { %v905_v37 = vadd.f32 %v1619_v45, %v841_v47  ;;  %v843_v30 = vadd.f32 %v842_v7, %v829_v39  ;;  %v671_v52 = vpop.permute.xlu1 %670  ;;  %v891_v39 = vrot.slane %v1619_v45, 2  ;;  %v559_v7 = vcombine.high %v1594_v57, %v1594_v57 }
 0x60e   :  { %v830_v54 = vmul.f32 %v817_v49, %v766_v50  ;;  %v818_v31 = vmul.f32 %v1297_v14, %v817_v49  ;;  %v677_v55 = vsel %vm102_vm2, %v671_v52, %v675_v51  ;;  %v709_v49 = vrot.slane %v1584_v43, %v708_v21 }
 0x60f   :  { %v936_v53 = vmul.f32 %v1623_v9, %v905_v37  ;;  %v844_v56 = vrot.slane %v843_v30, 2  ;;  %v682_v58 = vmul.f32 %v681_v15, %v677_v55  ;;  %v892_v57 = vrot.slane %v1619_v45, 3 }
 0x610   :  { %v848_v60 = vrot.slane %v830_v54, 4  ;;  %v1301_v50 = vpop.eup %1300  ;;  %v589_v29 = vrot.slane %v559_v7, %v1404_v34 }
 0x611   :  { %v845_v32 = vadd.f32 %v844_v56, %v843_v30  ;;  %v819_v8 = vadd.f32 %v818_v31, %v682_v58  ;;  %v945_v36 = vmul.f32 5.0, %v936_v53 }
 0x612   :  { %v849_v42 = vadd.f32 %v848_v60, %v830_v54  ;;  %v685_v62 = vpop.permute.xlu1 %684 }
 0x613   :  { %v846_v63 = vrot.slane %v845_v32, 1  ;;  %v831_v1 = vmul.f32 %v819_v8, %v775_v23  ;;  %v1194_v16 = vround.rtne.f32 %v945_v36  ;;  %v820_v27 = vmul.f32 %v1299_v18, %v819_v8 }
 0x614   :  { %v850_v5 = vrot.slane %v849_v42, 2  ;;  %v923_v23 = vrot.slane %v1623_v9, 3 }
 0x615   :  { %v847_v10 = vadd.f32 %v846_v63, %v845_v32  ;;  %v854_v12 = vrot.slane %v831_v1, 4  ;;  %v961_v38 = vmax.f32 %v1194_v16, -128.0  ;;  %v787_v32 = vpop.permute.xlu0 %786 }
 0x616   :  { %v851_v17 = vadd.f32 %v850_v5, %v849_v42 }
 0x617   :  { %v906_v61 = vadd.f32 %v890_v6, %v847_v10  ;;  %v855_v24 = vadd.f32 %v854_v12, %v831_v1  ;;  %v689_v20 = vpop.permute.xlu1 %688  ;;  %v969_v53 = vmin.f32 %v961_v38, 127.0  ;;  %v893_v38 = vrot.slane %v1619_v45, 4 }
 0x618   :  { %v852_v25 = vrot.slane %v851_v17, 1  ;;  %v691_v35 = vsel %vm102_vm2, %v685_v62, %v689_v20 }
 0x619   :  { %v937_v22 = vmul.f32 %v921_v19, %v906_v61  ;;  %v856_v26 = vrot.slane %v855_v24, 2  ;;  %v696_v28 = vmul.f32 %v695_v0, %v691_v35  ;;  %v989_v63 = vpack.c.bf16 %v969_v53, %v969_v53 }
 0x61a   :  { %v853_v40 = vadd.f32 %v852_v25, %v851_v17  ;;  %v608_v17 = vmul.f32 %v589_v29, %v1558_v13  ;;  %v561_v0 = vcombine.high %v1600_v3, %v1600_v3 }
 0x61b   :  { %v946_v44 = vmul.f32 5.0, %v937_v22  ;;  %v857_v47 = vadd.f32 %v856_v26, %v855_v24  ;;  %v821_v48 = vadd.f32 %v820_v27, %v696_v28  ;;  %v1005_v20 = vunpack.c.l.b16 %v989_v63 }
 0x61c   :  { %v907_v37 = vadd.f32 %v891_v39, %v853_v40  ;;  %v699_v14 = vpop.permute.xlu1 %698  ;;  %v622_v39 = vmul.f32 1.442695, %v608_v17  ;;  %v593_v3 = vrot.slane %v561_v0, %v1404_v34  ;;  %v925_v34 = vrot.slane %v1623_v9, 5 }
 0x61d   :  { %v1195_v51 = vround.rtne.f32 %v946_v44  ;;  %v858_v30 = vrot.slane %v857_v47, 1  ;;  %v832_v15 = vmul.f32 %v821_v48, %v784_v2  ;;  %v705_v52 = vsel %vm102_vm2, %v699_v14, %v703_v11 }
 0x61e   :  { %v938_v54 = vmul.f32 %v922_v46, %v907_v37  ;;  %v710_v31 = vmul.f32 %v709_v49, %v705_v52  ;;  %v822_v55 = vmul.f32 %v1301_v50, %v821_v48  ;;  %v924_v48 = vrot.slane %v1623_v9, 4 }
 0x61f   :  { %v962_v56 = vmax.f32 %v1195_v51, -128.0  ;;  %v859_v58 = vadd.f32 %v858_v30, %v857_v47  ;;  %v860_v59 = vrot.slane %v832_v15, 4  ;;  %1302 = vpow2.f32 %v622_v39 }
 0x620   :  { %v947_v41 = vmul.f32 5.0, %v938_v54  ;;  %v1654_v60 = vadd.f32 %v822_v55, %v710_v31  ;;  %v894_v54 = vrot.slane %v1619_v45, 5  ;;  %v736_v0 = vsub.s32 7, %v1401_v33 }
 0x621   :  { %v970_v8 = vmin.f32 %v962_v56, 127.0  ;;  %v908_v36 = vadd.f32 %v892_v57, %v859_v58  ;;  %v861_v42 = vadd.f32 %v860_v59, %v832_v15  ;;  %v791_v62 = vpop.permute.xlu1 %790  ;;  %v609_v15 = vmul.f32 %v593_v3, %v1558_v13 }
 0x622   :  { %v1196_v1 = vround.rtne.f32 %v947_v41  ;;  %v793_v4 = vsel %vm102_vm2, %v787_v32, %v791_v62  ;;  %v722_v59 = vsub.s32 6, %v1401_v33 }
 0x623   :  { %v990_v5 = vpack.c.bf16 %v970_v8, %v970_v8  ;;  %v939_v6 = vmul.f32 %v923_v23, %v908_v36  ;;  %v862_v10 = vrot.slane %v861_v42, 2  ;;  %v833_v12 = vmul.f32 %v1654_v60, %v793_v4 }
 0x624   :  { %v963_v16 = vmax.f32 %v1196_v1, -128.0  ;;  %v624_v41 = vmul.f32 1.442695, %v609_v15  ;;  %v723_v36 = vrot.slane %v1584_v43, %v722_v59  ;;  %v926_v15 = vrot.slane %v1623_v9, 6 }
 0x625   :  { %v1006_v18 = vunpack.c.l.b16 %v990_v5  ;;  %v948_v19 = vmul.f32 5.0, %v939_v6  ;;  %v863_v61 = vadd.f32 %v862_v10, %v861_v42  ;;  %v866_v24 = vrot.slane %v833_v12, 4 }
 0x626   :  { %v971_v25 = vmin.f32 %v963_v16, 127.0  ;;  %v796_v35 = vpop.permute.xlu1 %795  ;;  %1304 = vpow2.f32 %v624_v41  ;;  %v927_v59 = vrot.slane %v1623_v9, 7 }
 0x627   :  { %v1013_v21 = vrot.slane %v1006_v18, 7  ;;  %v1197_v22 = vround.rtne.f32 %v948_v19  ;;  %v864_v26 = vrot.slane %v863_v61, 1  ;;  %v867_v27 = vadd.f32 %v866_v24, %v833_v12  ;;  %v800_v12 = vpop.permute.xlu0 %799 }
 0x628   :  { %v991_v28 = vpack.c.bf16 %v971_v25, %v971_v25  ;;  %v802_v19 = vsel %vm102_vm2, %v796_v35, %v800_v12 }
 0x629   :  { %v964_v40 = vmax.f32 %v1197_v22, -128.0  ;;  %v865_v11 = vadd.f32 %v864_v26, %v863_v61  ;;  %v868_v44 = vrot.slane %v867_v27, 2  ;;  %v1015_v46 = vsel %vm1014_vm13, %v1013_v21, %v1005_v20  ;;  %v1303_v63 = vpop.eup %1302 }
 0x62a   :  { %v1007_v47 = vunpack.c.l.b16 %v991_v28  ;;  %v824_v5 = vmul.f32 %v1303_v63, %v1654_v60  ;;  %v737_v60 = vrot.slane %v1584_v43, %v736_v0  ;;  %v895_v43 = vrot.slane %v1619_v45, 6 }
 0x62b   :  { %v972_v7 = vmin.f32 %v964_v40, 127.0  ;;  %v909_v2 = vadd.f32 %v893_v38, %v865_v11  ;;  %v869_v37 = vadd.f32 %v868_v44, %v867_v27  ;;  %v1665_v49 = vpop.permute.xlu1 %804 }
 0x62c   :  { %v1016_v14 = vrot.slane %v1007_v47, 6 }
 0x62d   :  { %v940_v50 = vmul.f32 %v924_v48, %v909_v2  ;;  %v870_v51 = vrot.slane %v869_v37, 1  ;;  %v992_v30 = vpack.c.bf16 %v972_v7, %v972_v7 }
 0x62e   :  { %v1018_v52 = vsel %vm1017_vm14, %v1016_v14, %v1015_v46 }
 0x62f   :  { %v949_v53 = vmul.f32 5.0, %v940_v50  ;;  %v871_v31 = vadd.f32 %v870_v51, %v869_v37  ;;  %v1008_v55 = vunpack.c.l.b16 %v992_v30 }
 0x630   :  { %v713_v56 = vpop.permute.xlu1 %712  ;;  %v1305_v39 = vpop.eup %1304 }
 0x631   :  { %v1198_v57 = vround.rtne.f32 %v949_v53  ;;  %v910_v58 = vadd.f32 %v894_v54, %v871_v31  ;;  %v1019_v29 = vrot.slane %v1008_v55, 5 }
 0x633   :  { %v941_v32 = vmul.f32 %v925_v34, %v910_v58  ;;  %v965_v8 = vmax.f32 %v1198_v57, -128.0  ;;  %v1021_v23 = vsel %vm1020_vm15, %v1019_v29, %v1018_v52 }
 0x635   :  { %v950_v13 = vmul.f32 5.0, %v941_v32  ;;  %v717_v42 = vpop.permute.xlu1 %716  ;;  %v973_v62 = vmin.f32 %v965_v8, 127.0 }
 0x636   :  { %v719_v1 = vsel %vm102_vm2, %v713_v56, %v717_v42  ;;  %v896_v56 = vrot.slane %v1619_v45, 7 }
 0x637   :  { %v1199_v4 = vround.rtne.f32 %v950_v13  ;;  %v724_v6 = vmul.f32 %v723_v36, %v719_v1  ;;  %v993_v10 = vpack.c.bf16 %v973_v62, %v973_v62 }
 0x639   :  { %v966_v16 = vmax.f32 %v1199_v4, -128.0  ;;  %v825_v17 = vadd.f32 %v824_v5, %v724_v6  ;;  %v1009_v18 = vunpack.c.l.b16 %v993_v10 }
 0x63a   :  { %v727_v61 = vpop.permute.xlu1 %726 }
 0x63b   :  { %v834_v24 = vmul.f32 %v825_v17, %v802_v19  ;;  %v974_v20 = vmin.f32 %v966_v16, 127.0  ;;  %v1022_v25 = vrot.slane %v1009_v18, 4  ;;  %v826_v44 = vmul.f32 %v1305_v39, %v825_v17 }
 0x63d   :  { %v872_v21 = vrot.slane %v834_v24, 4  ;;  %v994_v22 = vpack.c.bf16 %v974_v20, %v974_v20  ;;  %v1024_v26 = vsel %vm1023_vm0, %v1022_v25, %v1021_v23 }
 0x63f   :  { %v873_v27 = vadd.f32 %v872_v21, %v834_v24  ;;  %v731_v28 = vpop.permute.xlu1 %730  ;;  %v1010_v38 = vunpack.c.l.b16 %v994_v22 }
 0x640   :  { %v733_v40 = vsel %vm102_vm2, %v727_v61, %v731_v28 }
 0x641   :  { %v874_v35 = vrot.slane %v873_v27, 2  ;;  %v738_v11 = vmul.f32 %v737_v60, %v733_v40  ;;  %v1025_v46 = vrot.slane %v1010_v38, 3 }
 0x643   :  { %v875_v47 = vadd.f32 %v874_v35, %v873_v27  ;;  %v827_v33 = vadd.f32 %v826_v44, %v738_v11  ;;  %v809_v48 = vpop.permute.xlu1 %808  ;;  %v1027_v3 = vsel %vm1026_vm1, %v1025_v46, %v1024_v26 }
 0x644   :  { %v811_v7 = vsel %vm102_vm2, %v1665_v49, %v809_v48  ;;  %vm1029_vm2 = vcmask 1046534  }
 0x645   :  { %v876_v2 = vrot.slane %v875_v47, 1  ;;  %v835_v37 = vmul.f32 %v827_v33, %v811_v7 }
 0x647   :  { %v877_v14 = vadd.f32 %v876_v2, %v875_v47  ;;  %v878_v50 = vrot.slane %v835_v37, 4 }
 0x649   :  { %v911_v51 = vadd.f32 %v895_v43, %v877_v14  ;;  %v879_v30 = vadd.f32 %v878_v50, %v835_v37 }
 0x64b   :  { %v880_v52 = vrot.slane %v879_v30, 2  ;;  %v942_v53 = vmul.f32 %v926_v15, %v911_v51 }
 0x64d   :  { %v881_v54 = vadd.f32 %v880_v52, %v879_v30  ;;  %v951_v31 = vmul.f32 5.0, %v942_v53 }
 0x64f   :  { %v882_v55 = vrot.slane %v881_v54, 1  ;;  %v1200_v34 = vround.rtne.f32 %v951_v31 }
 0x651   :  { %v883_v57 = vadd.f32 %v882_v55, %v881_v54  ;;  %v967_v49 = vmax.f32 %v1200_v34, -128.0 }
 0x653   :  { %v912_v58 = vadd.f32 %v896_v56, %v883_v57  ;;  %v975_v29 = vmin.f32 %v967_v49, 127.0 }
 0x655   :  { %v943_v41 = vmul.f32 %v927_v59, %v912_v58  ;;  %v995_v32 = vpack.c.bf16 %v975_v29, %v975_v29 }
 0x657   :  { %v952_v8 = vmul.f32 5.0, %v943_v41  ;;  %v1011_v23 = vunpack.c.l.b16 %v995_v32 }
 0x659   :  { %v1201_v13 = vround.rtne.f32 %v952_v8  ;;  %v1028_v36 = vrot.slane %v1011_v23, 2 }
 0x65b   :  { %v968_v42 = vmax.f32 %v1201_v13, -128.0  ;;  %v1030_v62 = vsel %vm1029_vm2, %v1028_v36, %v1027_v3 }
 0x65d   :  { %v976_v63 = vmin.f32 %v968_v42, 127.0 }
 0x65f   :  { %v996_v1 = vpack.c.bf16 %v976_v63, %v976_v63 }
 0x661   :  { %v1012_v4 = vunpack.c.l.b16 %v996_v1 }
 0x663   :  { %v1031_v45 = vrot.slane %v1012_v4, 1 }
 0x665   :  { %v1033_v5 = vsel %vm1032_vm3, %v1031_v45, %v1030_v62 }
 0x666   :  { %v1034_v6 = vpack.c.b16 %v1033_v5, %v1033_v5 }
 0x668   :  { %1172 = vmatmul.mubr.bf16.vlgmr.msra.gmra.mrb[0].mxu1 %v1034_v6 }
 0x73b   :  { %v1070_v10 = vpop.f32.mrb[0].mxu1 }
 0x73c   :  { %v1076_v9 = vmul.f32 0.002, %v1070_v10  ;;  %v1173_v12 = vpop.f32.mrb[1].mxu1 }
 0x73d   :  { %v1073_v16 = vpop.f32.mrb[2].mxu1 }
 0x73e   :  { %v1077_v17 = vpack.c.bf16 %v1076_v9, %v1076_v9  ;;  %v1174_v18 = vpop.f32.mrb[3].mxu1 }
 0x740   :  { %1079 = vst.msk [vmem:[%s1693_s6] sm:$0xf] %vm1078_vm4, %v1077_v17 }

</bundles_post_ra>
